<compile_context>
chip_gen: v5e
topology: v5e:2x2
jax: 0.10.0
libtpu: 0.0.40
codegen_flags: <defaults>
</compile_context>

<pallas_src>
import functools

import jax
import jax.numpy as jnp
from jax import lax
from jax.experimental import pallas as pl
from jax.experimental.pallas import tpu as pltpu


# ----------------------------------------------------------------------------
# Kernel: fused bidirectional LSTM over one block of queries
# ----------------------------------------------------------------------------
def _bilstm_kernel(x_ref, wih_ref, whh_ref, b_ref, out_ref, *, seq_len, block_b):
    """Fused bidirectional LSTM for a block of `block_b` queries.

    x_ref   : (T*block_b, 2E) bf16  time-major rows; row t*block_b+j holds
                                    [x_t | x_{T-1-t}] for query j of the block
    wih_ref : (2E, 8H) bf16         block-structured, gate-interleaved input weights
    whh_ref : (2H, 8H) bf16         block-structured, gate-interleaved recurrent weights
    b_ref   : (1, 8H)  f32          gate-interleaved bias (b_ih + b_hh, both dirs)
    out_ref : (block_b, 2H) f32     [h_fwd_final | h_bwd_final] per query
    """
    T = seq_len
    Bblk = block_b
    H8 = whh_ref.shape[1]
    H2 = H8 // 4                         # 2*H: combined fwd|bwd state width

    wih = wih_ref[...]                   # (2E, 8H) bf16
    whh = whh_ref[...]                   # (2H, 8H) bf16

    # Hoisted input projection: gate inputs for every (timestep, query) in the
    # block and both directions in a single MXU matmul.  Row t*Bblk+j already
    # holds the forward gates for x[t] (even H-blocks) and the backward gates
    # for x[T-1-t] (odd H-blocks) of query j.
    pre = jnp.dot(x_ref[...], wih,
                  preferred_element_type=jnp.float32) + b_ref[...]   # (T*Bblk, 8H) f32

    h = jnp.zeros((Bblk, H2), jnp.float32)      # [h_f | h_b]
    c = jnp.zeros((Bblk, H2), jnp.float32)      # [c_f | c_b]

    def sig(v):
        # Single EUP push per gate: sigmoid(x) = 0.5*tanh(0.5*x) + 0.5.
        return 0.5 * jnp.tanh(0.5 * v) + 0.5

    # Fully unrolled recurrence (T is a small static trip count).  One
    # (Bblk,2H)@(2H,8H) bf16 matmul per step drives both directions; all gate
    # slices are exactly 2H = 128 lanes -> whole-vreg, no masked selects.
    for s in range(T):
        gates = jnp.dot(h.astype(whh.dtype), whh,
                        preferred_element_type=jnp.float32) \
            + pre[s * Bblk:(s + 1) * Bblk, :]              # (Bblk, 8H) f32
        i = sig(gates[:, 0:H2])                            # [i_f | i_b]
        f = sig(gates[:, H2:2 * H2])                       # [f_f | f_b]
        g = jnp.tanh(gates[:, 2 * H2:3 * H2])              # [g_f | g_b]
        o = sig(gates[:, 3 * H2:4 * H2])                   # [o_f | o_b]
        c = f * c + i * g
        h = o * jnp.tanh(c)

    # h rows are already [final forward hidden | final backward hidden] per
    # query == h_n.permute(1,0,2).reshape(B, 2H).  Lane-dense (128) store.
    out_ref[...] = h


# ----------------------------------------------------------------------------
# One-time weight packing (PyTorch layout -> fused kernel layout, bf16)
# ----------------------------------------------------------------------------
def pack_params(params):
    """Pack per-direction weights into block-structured, gate-interleaved form.

    Called ONCE at init/checkpoint-load time (hoisted out of the per-call path).
    Column layout of every packed matrix: [i_f|i_b|f_f|f_b|g_f|g_b|o_f|o_b],
    each block of width H.  Row blocks: top rows feed forward gates only,
    bottom rows feed backward gates only.  Matmul operands are cast to bf16.
    """
    H = params["whh_f"].shape[0]

    def gate_blocks(w):                                   # (R, 4H) -> (R, 4, H)
        return w.reshape(w.shape[0], 4, H)

    def interleave(wf, wb):                               # -> (R, 8H)
        return jnp.stack([gate_blocks(wf), gate_blocks(wb)],
                         axis=2).reshape(wf.shape[0], 8 * H)

    def block_interleave(wf, wb):                         # -> (Rf+Rb, 8H)
        top = interleave(wf, jnp.zeros_like(wf))          # forward rows
        bot = interleave(jnp.zeros_like(wb), wb)          # backward rows
        return jnp.concatenate([top, bot], axis=0)

    wih_blk = block_interleave(params["wih_f"], params["wih_b"])   # (2E, 8H)
    whh_blk = block_interleave(params["whh_f"], params["whh_b"])   # (2H, 8H)
    b_cat = interleave(params["b_f"], params["b_b"])               # (1, 8H)
    return dict(
        embed=params["embed"],                    # (V, E) f32
        wih=wih_blk.astype(jnp.bfloat16),
        whh=whh_blk.astype(jnp.bfloat16),
        b=b_cat.astype(jnp.float32),
        H=H,
    )


# ----------------------------------------------------------------------------
# Batched query encoder (equivalent of TwoTowers.encode_queries)
# ----------------------------------------------------------------------------
def encode_queries(tokens_batch, packed, *, block_b=8):
    """tokens_batch: (B, T) int32 -> (B, 2*encoded_dim) f32 query encodings."""
    embed = packed["embed"]
    wih_blk, whh_blk, b_cat = packed["wih"], packed["whh"], packed["b"]
    H2 = whh_blk.shape[0]                              # 2H
    V, E = embed.shape
    B, T = tokens_batch.shape

    # Pad the query batch up to a multiple of the block size.
    nb = pl.cdiv(B, block_b)
    B_pad = nb * block_b
    if B_pad != B:
        tokens_batch = jnp.pad(tokens_batch, ((0, B_pad - B), (0, 0)))

    # Embedding gather stays OUTSIDE the kernel: only the B*T required rows are
    # ever read; the (V, E) table never gets DMA'd into VMEM.  Clamp token ids
    # so untrusted inputs can't read past the table (PyTorch would raise here —
    # documented semantic difference).
    tok = jnp.clip(tokens_batch.astype(jnp.int32), 0, V - 1)
    x_seq = jnp.take(embed, tok, axis=0)                               # (B_pad, T, E)
    # Row t carries [x_t | x_{T-1-t}] so the backward direction's gate inputs
    # come out of the same hoisted projection with no in-kernel reversal.
    x_bi = jnp.concatenate([x_seq, x_seq[:, ::-1, :]], axis=2)         # (B_pad, T, 2E)
    # Re-order block-major / time-major so each grid block sees one contiguous
    # (T*block_b, 2E) slab whose per-timestep rows are sublane-aligned chunks.
    x_blk = (x_bi.reshape(nb, block_b, T, 2 * E)
             .transpose(0, 2, 1, 3)
             .reshape(nb * T * block_b, 2 * E)
             .astype(jnp.bfloat16))                                    # (nb*T*Bb, 2E)

    kernel = functools.partial(_bilstm_kernel, seq_len=T, block_b=block_b)
    out = pl.pallas_call(
        kernel,
        out_shape=jax.ShapeDtypeStruct((B_pad, H2), jnp.float32),
        grid_spec=pltpu.PrefetchScalarGridSpec(
            num_scalar_prefetch=0,
            grid=(nb,),
            in_specs=[
                pl.BlockSpec((T * block_b, 2 * E), lambda i: (i, 0)),
                # Weights/bias: constant index_maps -> fetched once, VMEM-resident
                # across all grid iterations.
                pl.BlockSpec(wih_blk.shape, lambda i: (0, 0)),
                pl.BlockSpec(whh_blk.shape, lambda i: (0, 0)),
                pl.BlockSpec(b_cat.shape, lambda i: (0, 0)),
            ],
            out_specs=pl.BlockSpec((block_b, H2), lambda i: (i, 0)),
        ),
        compiler_params=pltpu.CompilerParams(
            dimension_semantics=("parallel",)),     # shards blocks across v7x's 2 TCs
    )(x_blk, wih_blk, whh_blk, b_cat)
    return out[:B]


def two_towers_forward(tokens, packed):
    """Module forward(query): single query -> (2*encoded_dim,) f32 encoding."""
    return encode_queries(tokens[None, :], packed)[0]


# ----------------------------------------------------------------------------
# Parameter init (matches the PyTorch module's layers, pre-transposed)
# ----------------------------------------------------------------------------
def init_params(key, vocab_size, token_embed_dims, encoded_dim):
    E, H = token_embed_dims, encoded_dim
    ks = jax.random.split(key, 9)
    s = 1.0 / float(jnp.sqrt(H))

    def u(k, shape):
        return jax.random.uniform(k, shape, jnp.float32, -s, s)

    # nn.Embedding default init ~ N(0, 1)
    embed = jax.random.normal(ks[0], (vocab_size, E), jnp.float32)
    # PyTorch stores (4H, E)/(4H, H); we keep them pre-transposed (E,4H)/(H,4H).
    return dict(
        embed=embed,
        wih_f=u(ks[1], (E, 4 * H)),
        whh_f=u(ks[2], (H, 4 * H)),
        b_f=u(ks[3], (1, 4 * H)) + u(ks[4], (1, 4 * H)),   # b_ih + b_hh
        wih_b=u(ks[5], (E, 4 * H)),
        whh_b=u(ks[6], (H, 4 * H)),
        b_b=u(ks[7], (1, 4 * H)) + u(ks[8], (1, 4 * H)),
    )


# ----------------------------------------------------------------------------
# Pure-JAX f32 reference (un-fused, per-direction) for correctness checking
# ----------------------------------------------------------------------------
def _lstm_ref(x_seq, wih, whh, b, H, reverse):
    if reverse:
        x_seq = x_seq[::-1]

    def step(carry, x):
        h, c = carry
        gates = x[None, :] @ wih + h @ whh + b
        i = jax.nn.sigmoid(gates[:, :H])
        f = jax.nn.sigmoid(gates[:, H:2 * H])
        g = jnp.tanh(gates[:, 2 * H:3 * H])
        o = jax.nn.sigmoid(gates[:, 3 * H:4 * H])
        c = f * c + i * g
        h = o * jnp.tanh(c)
        return (h, c), None

    init = (jnp.zeros((1, H), jnp.float32), jnp.zeros((1, H), jnp.float32))
    (h, _), _ = lax.scan(step, init, x_seq)
    return h[0]


def _forward_ref(tokens, params):
    H = params["whh_f"].shape[0]
    x_seq = params["embed"][tokens]
    h_f = _lstm_ref(x_seq, params["wih_f"], params["whh_f"], params["b_f"], H, False)
    h_b = _lstm_ref(x_seq, params["wih_b"], params["whh_b"], params["b_b"], H, True)
    return jnp.concatenate([h_f, h_b], axis=0)


if __name__ == "__main__":
    # Small, deterministic configuration consistent with the module:
    #   token_embed_dims=32, encoded_dim=64, vocab_size=128, query length T=8,
    #   batch of 16 queries (2 grid blocks of 8).
    VOCAB, E, H, T, B = 128, 32, 64, 8, 16

    key = jax.random.PRNGKey(0)
    k_params, k_tok = jax.random.split(key)
    params = init_params(k_params, VOCAB, E, H)
    packed = pack_params(params)   # one-time packing, hoisted out of the call path
    tokens_batch = jax.random.randint(k_tok, (B, T), 0, VOCAB, dtype=jnp.int32)

    # Batched encode (the optimized path).
    enc = jax.block_until_ready(encode_queries(tokens_batch, packed))
    assert enc.shape == (B, 2 * H)

    ref = jnp.stack([_forward_ref(tokens_batch[b], params) for b in range(B)])
    # bf16 matmul operands -> looser tolerance than the pure-f32 reference.
    assert jnp.allclose(enc, ref, atol=2e-2, rtol=2e-2), "batched mismatch vs JAX reference"

    # Single-query forward (the module's forward(query) semantics).
    single = jax.block_until_ready(two_towers_forward(tokens_batch[0], packed))
    assert single.shape == (2 * H,)
    assert jnp.allclose(single, ref[0], atol=2e-2, rtol=2e-2), "single-query mismatch"

    print("KERNEL_OK")
</pallas_src>

<mosaic_0001>
module attributes {stable_mosaic.version = 11 : i64} {
  func.func @_bilstm_kernel(%arg0: i32, %arg1: memref<64x64xbf16, #tpu.memory_space<vmem>>, %arg2: memref<64x512xbf16, #tpu.memory_space<vmem>>, %arg3: memref<128x512xbf16, #tpu.memory_space<vmem>>, %arg4: memref<1x512xf32, #tpu.memory_space<vmem>>, %arg5: memref<8x128xf32, #tpu.memory_space<vmem>>) attributes {dimension_semantics = [#tpu.dimension_semantics<parallel>], iteration_bounds = array<i64: 2>, scalar_prefetch = 0 : i64, scratch_operands = 0 : i64, tpu.core_type = #tpu.core_type<tc>, window_params = [{transform_indices = @transform_0, window_bounds = array<i64: 64, 64>}, {pipeline_mode = #tpu.pipeline_mode<synchronous>, transform_indices = @transform_1, window_bounds = array<i64: 64, 512>}, {pipeline_mode = #tpu.pipeline_mode<synchronous>, transform_indices = @transform_2, window_bounds = array<i64: 128, 512>}, {pipeline_mode = #tpu.pipeline_mode<synchronous>, transform_indices = @transform_3, window_bounds = array<i64: 1, 512>}, {transform_indices = @transform_4, window_bounds = array<i64: 8, 128>}]} {
    %c0 = arith.constant 0 : index
    %c0_0 = arith.constant 0 : index
    %0 = vector.load %arg2[%c0, %c0_0] : memref<64x512xbf16, #tpu.memory_space<vmem>>, vector<64x512xbf16>
    %c0_1 = arith.constant 0 : index
    %c0_2 = arith.constant 0 : index
    %1 = vector.load %arg3[%c0_1, %c0_2] : memref<128x512xbf16, #tpu.memory_space<vmem>>, vector<128x512xbf16>
    %c0_3 = arith.constant 0 : index
    %c0_4 = arith.constant 0 : index
    %2 = vector.load %arg1[%c0_3, %c0_4] : memref<64x64xbf16, #tpu.memory_space<vmem>>, vector<64x64xbf16>
    %cst = arith.constant dense<0.000000e+00> : vector<64x512xf32>
    %3 = tpu.matmul %2, %0, %cst {dimension_numbers = #tpu.dot_dimension_numbers<[1], [0], [0], [1], [0, 0, 1, 1], [], []>} : vector<64x64xbf16>, vector<64x512xbf16>, vector<64x512xf32> -> vector<64x512xf32>
    %c0_5 = arith.constant 0 : index
    %c0_6 = arith.constant 0 : index
    %4 = vector.load %arg4[%c0_5, %c0_6] : memref<1x512xf32, #tpu.memory_space<vmem>>, vector<1x512xf32>
    %5 = vector.broadcast %4 : vector<1x512xf32> to vector<64x512xf32>
    %6 = arith.addf %3, %5 : vector<64x512xf32>
    %cst_7 = arith.constant 0.000000e+00 : f32
    %7 = vector.broadcast %cst_7 : f32 to vector<8x128xf32>
    %cst_8 = arith.constant 0.000000e+00 : f32
    %8 = vector.broadcast %cst_8 : f32 to vector<8x128xf32>
    %9 = arith.truncf %7 : vector<8x128xf32> to vector<8x128xbf16>
    %cst_9 = arith.constant dense<0.000000e+00> : vector<8x512xf32>
    %10 = tpu.matmul %9, %1, %cst_9 {dimension_numbers = #tpu.dot_dimension_numbers<[1], [0], [0], [1], [0, 0, 1, 1], [], []>} : vector<8x128xbf16>, vector<128x512xbf16>, vector<8x512xf32> -> vector<8x512xf32>
    %11 = vector.extract_strided_slice %6 {offsets = [0, 0], sizes = [8, 512], strides = [1, 1]} : vector<64x512xf32> to vector<8x512xf32>
    %12 = arith.addf %10, %11 : vector<8x512xf32>
    %13 = vector.extract_strided_slice %12 {offsets = [0, 0], sizes = [8, 128], strides = [1, 1]} : vector<8x512xf32> to vector<8x128xf32>
    %cst_10 = arith.constant 5.000000e-01 : f32
    %14 = vector.broadcast %cst_10 : f32 to vector<8x128xf32>
    %15 = arith.mulf %14, %13 : vector<8x128xf32>
    %16 = math.tanh %15 : vector<8x128xf32>
    %cst_11 = arith.constant 5.000000e-01 : f32
    %17 = vector.broadcast %cst_11 : f32 to vector<8x128xf32>
    %18 = arith.mulf %17, %16 : vector<8x128xf32>
    %cst_12 = arith.constant 5.000000e-01 : f32
    %19 = vector.broadcast %cst_12 : f32 to vector<8x128xf32>
    %20 = arith.addf %18, %19 : vector<8x128xf32>
    %21 = vector.extract_strided_slice %12 {offsets = [0, 128], sizes = [8, 128], strides = [1, 1]} : vector<8x512xf32> to vector<8x128xf32>
    %cst_13 = arith.constant 5.000000e-01 : f32
    %22 = vector.broadcast %cst_13 : f32 to vector<8x128xf32>
    %23 = arith.mulf %22, %21 : vector<8x128xf32>
    %24 = math.tanh %23 : vector<8x128xf32>
    %cst_14 = arith.constant 5.000000e-01 : f32
    %25 = vector.broadcast %cst_14 : f32 to vector<8x128xf32>
    %26 = arith.mulf %25, %24 : vector<8x128xf32>
    %cst_15 = arith.constant 5.000000e-01 : f32
    %27 = vector.broadcast %cst_15 : f32 to vector<8x128xf32>
    %28 = arith.addf %26, %27 : vector<8x128xf32>
    %29 = vector.extract_strided_slice %12 {offsets = [0, 256], sizes = [8, 128], strides = [1, 1]} : vector<8x512xf32> to vector<8x128xf32>
    %30 = math.tanh %29 : vector<8x128xf32>
    %31 = vector.extract_strided_slice %12 {offsets = [0, 384], sizes = [8, 128], strides = [1, 1]} : vector<8x512xf32> to vector<8x128xf32>
    %cst_16 = arith.constant 5.000000e-01 : f32
    %32 = vector.broadcast %cst_16 : f32 to vector<8x128xf32>
    %33 = arith.mulf %32, %31 : vector<8x128xf32>
    %34 = math.tanh %33 : vector<8x128xf32>
    %cst_17 = arith.constant 5.000000e-01 : f32
    %35 = vector.broadcast %cst_17 : f32 to vector<8x128xf32>
    %36 = arith.mulf %35, %34 : vector<8x128xf32>
    %cst_18 = arith.constant 5.000000e-01 : f32
    %37 = vector.broadcast %cst_18 : f32 to vector<8x128xf32>
    %38 = arith.addf %36, %37 : vector<8x128xf32>
    %39 = arith.mulf %28, %8 : vector<8x128xf32>
    %40 = arith.mulf %20, %30 : vector<8x128xf32>
    %41 = arith.addf %39, %40 : vector<8x128xf32>
    %42 = math.tanh %41 : vector<8x128xf32>
    %43 = arith.mulf %38, %42 : vector<8x128xf32>
    %44 = arith.truncf %43 : vector<8x128xf32> to vector<8x128xbf16>
    %cst_19 = arith.constant dense<0.000000e+00> : vector<8x512xf32>
    %45 = tpu.matmul %44, %1, %cst_19 {dimension_numbers = #tpu.dot_dimension_numbers<[1], [0], [0], [1], [0, 0, 1, 1], [], []>} : vector<8x128xbf16>, vector<128x512xbf16>, vector<8x512xf32> -> vector<8x512xf32>
    %46 = vector.extract_strided_slice %6 {offsets = [8, 0], sizes = [8, 512], strides = [1, 1]} : vector<64x512xf32> to vector<8x512xf32>
    %47 = arith.addf %45, %46 : vector<8x512xf32>
    %48 = vector.extract_strided_slice %47 {offsets = [0, 0], sizes = [8, 128], strides = [1, 1]} : vector<8x512xf32> to vector<8x128xf32>
    %cst_20 = arith.constant 5.000000e-01 : f32
    %49 = vector.broadcast %cst_20 : f32 to vector<8x128xf32>
    %50 = arith.mulf %49, %48 : vector<8x128xf32>
    %51 = math.tanh %50 : vector<8x128xf32>
    %cst_21 = arith.constant 5.000000e-01 : f32
    %52 = vector.broadcast %cst_21 : f32 to vector<8x128xf32>
    %53 = arith.mulf %52, %51 : vector<8x128xf32>
    %cst_22 = arith.constant 5.000000e-01 : f32
    %54 = vector.broadcast %cst_22 : f32 to vector<8x128xf32>
    %55 = arith.addf %53, %54 : vector<8x128xf32>
    %56 = vector.extract_strided_slice %47 {offsets = [0, 128], sizes = [8, 128], strides = [1, 1]} : vector<8x512xf32> to vector<8x128xf32>
    %cst_23 = arith.constant 5.000000e-01 : f32
    %57 = vector.broadcast %cst_23 : f32 to vector<8x128xf32>
    %58 = arith.mulf %57, %56 : vector<8x128xf32>
    %59 = math.tanh %58 : vector<8x128xf32>
    %cst_24 = arith.constant 5.000000e-01 : f32
    %60 = vector.broadcast %cst_24 : f32 to vector<8x128xf32>
    %61 = arith.mulf %60, %59 : vector<8x128xf32>
    %cst_25 = arith.constant 5.000000e-01 : f32
    %62 = vector.broadcast %cst_25 : f32 to vector<8x128xf32>
    %63 = arith.addf %61, %62 : vector<8x128xf32>
    %64 = vector.extract_strided_slice %47 {offsets = [0, 256], sizes = [8, 128], strides = [1, 1]} : vector<8x512xf32> to vector<8x128xf32>
    %65 = math.tanh %64 : vector<8x128xf32>
    %66 = vector.extract_strided_slice %47 {offsets = [0, 384], sizes = [8, 128], strides = [1, 1]} : vector<8x512xf32> to vector<8x128xf32>
    %cst_26 = arith.constant 5.000000e-01 : f32
    %67 = vector.broadcast %cst_26 : f32 to vector<8x128xf32>
    %68 = arith.mulf %67, %66 : vector<8x128xf32>
    %69 = math.tanh %68 : vector<8x128xf32>
    %cst_27 = arith.constant 5.000000e-01 : f32
    %70 = vector.broadcast %cst_27 : f32 to vector<8x128xf32>
    %71 = arith.mulf %70, %69 : vector<8x128xf32>
    %cst_28 = arith.constant 5.000000e-01 : f32
    %72 = vector.broadcast %cst_28 : f32 to vector<8x128xf32>
    %73 = arith.addf %71, %72 : vector<8x128xf32>
    %74 = arith.mulf %63, %41 : vector<8x128xf32>
    %75 = arith.mulf %55, %65 : vector<8x128xf32>
    %76 = arith.addf %74, %75 : vector<8x128xf32>
    %77 = math.tanh %76 : vector<8x128xf32>
    %78 = arith.mulf %73, %77 : vector<8x128xf32>
    %79 = arith.truncf %78 : vector<8x128xf32> to vector<8x128xbf16>
    %cst_29 = arith.constant dense<0.000000e+00> : vector<8x512xf32>
    %80 = tpu.matmul %79, %1, %cst_29 {dimension_numbers = #tpu.dot_dimension_numbers<[1], [0], [0], [1], [0, 0, 1, 1], [], []>} : vector<8x128xbf16>, vector<128x512xbf16>, vector<8x512xf32> -> vector<8x512xf32>
    %81 = vector.extract_strided_slice %6 {offsets = [16, 0], sizes = [8, 512], strides = [1, 1]} : vector<64x512xf32> to vector<8x512xf32>
    %82 = arith.addf %80, %81 : vector<8x512xf32>
    %83 = vector.extract_strided_slice %82 {offsets = [0, 0], sizes = [8, 128], strides = [1, 1]} : vector<8x512xf32> to vector<8x128xf32>
    %cst_30 = arith.constant 5.000000e-01 : f32
    %84 = vector.broadcast %cst_30 : f32 to vector<8x128xf32>
    %85 = arith.mulf %84, %83 : vector<8x128xf32>
    %86 = math.tanh %85 : vector<8x128xf32>
    %cst_31 = arith.constant 5.000000e-01 : f32
    %87 = vector.broadcast %cst_31 : f32 to vector<8x128xf32>
    %88 = arith.mulf %87, %86 : vector<8x128xf32>
    %cst_32 = arith.constant 5.000000e-01 : f32
    %89 = vector.broadcast %cst_32 : f32 to vector<8x128xf32>
    %90 = arith.addf %88, %89 : vector<8x128xf32>
    %91 = vector.extract_strided_slice %82 {offsets = [0, 128], sizes = [8, 128], strides = [1, 1]} : vector<8x512xf32> to vector<8x128xf32>
    %cst_33 = arith.constant 5.000000e-01 : f32
    %92 = vector.broadcast %cst_33 : f32 to vector<8x128xf32>
    %93 = arith.mulf %92, %91 : vector<8x128xf32>
    %94 = math.tanh %93 : vector<8x128xf32>
    %cst_34 = arith.constant 5.000000e-01 : f32
    %95 = vector.broadcast %cst_34 : f32 to vector<8x128xf32>
    %96 = arith.mulf %95, %94 : vector<8x128xf32>
    %cst_35 = arith.constant 5.000000e-01 : f32
    %97 = vector.broadcast %cst_35 : f32 to vector<8x128xf32>
    %98 = arith.addf %96, %97 : vector<8x128xf32>
    %99 = vector.extract_strided_slice %82 {offsets = [0, 256], sizes = [8, 128], strides = [1, 1]} : vector<8x512xf32> to vector<8x128xf32>
    %100 = math.tanh %99 : vector<8x128xf32>
    %101 = vector.extract_strided_slice %82 {offsets = [0, 384], sizes = [8, 128], strides = [1, 1]} : vector<8x512xf32> to vector<8x128xf32>
    %cst_36 = arith.constant 5.000000e-01 : f32
    %102 = vector.broadcast %cst_36 : f32 to vector<8x128xf32>
    %103 = arith.mulf %102, %101 : vector<8x128xf32>
    %104 = math.tanh %103 : vector<8x128xf32>
    %cst_37 = arith.constant 5.000000e-01 : f32
    %105 = vector.broadcast %cst_37 : f32 to vector<8x128xf32>
    %106 = arith.mulf %105, %104 : vector<8x128xf32>
    %cst_38 = arith.constant 5.000000e-01 : f32
    %107 = vector.broadcast %cst_38 : f32 to vector<8x128xf32>
    %108 = arith.addf %106, %107 : vector<8x128xf32>
    %109 = arith.mulf %98, %76 : vector<8x128xf32>
    %110 = arith.mulf %90, %100 : vector<8x128xf32>
    %111 = arith.addf %109, %110 : vector<8x128xf32>
    %112 = math.tanh %111 : vector<8x128xf32>
    %113 = arith.mulf %108, %112 : vector<8x128xf32>
    %114 = arith.truncf %113 : vector<8x128xf32> to vector<8x128xbf16>
    %cst_39 = arith.constant dense<0.000000e+00> : vector<8x512xf32>
    %115 = tpu.matmul %114, %1, %cst_39 {dimension_numbers = #tpu.dot_dimension_numbers<[1], [0], [0], [1], [0, 0, 1, 1], [], []>} : vector<8x128xbf16>, vector<128x512xbf16>, vector<8x512xf32> -> vector<8x512xf32>
    %116 = vector.extract_strided_slice %6 {offsets = [24, 0], sizes = [8, 512], strides = [1, 1]} : vector<64x512xf32> to vector<8x512xf32>
    %117 = arith.addf %115, %116 : vector<8x512xf32>
    %118 = vector.extract_strided_slice %117 {offsets = [0, 0], sizes = [8, 128], strides = [1, 1]} : vector<8x512xf32> to vector<8x128xf32>
    %cst_40 = arith.constant 5.000000e-01 : f32
    %119 = vector.broadcast %cst_40 : f32 to vector<8x128xf32>
    %120 = arith.mulf %119, %118 : vector<8x128xf32>
    %121 = math.tanh %120 : vector<8x128xf32>
    %cst_41 = arith.constant 5.000000e-01 : f32
    %122 = vector.broadcast %cst_41 : f32 to vector<8x128xf32>
    %123 = arith.mulf %122, %121 : vector<8x128xf32>
    %cst_42 = arith.constant 5.000000e-01 : f32
    %124 = vector.broadcast %cst_42 : f32 to vector<8x128xf32>
    %125 = arith.addf %123, %124 : vector<8x128xf32>
    %126 = vector.extract_strided_slice %117 {offsets = [0, 128], sizes = [8, 128], strides = [1, 1]} : vector<8x512xf32> to vector<8x128xf32>
    %cst_43 = arith.constant 5.000000e-01 : f32
    %127 = vector.broadcast %cst_43 : f32 to vector<8x128xf32>
    %128 = arith.mulf %127, %126 : vector<8x128xf32>
    %129 = math.tanh %128 : vector<8x128xf32>
    %cst_44 = arith.constant 5.000000e-01 : f32
    %130 = vector.broadcast %cst_44 : f32 to vector<8x128xf32>
    %131 = arith.mulf %130, %129 : vector<8x128xf32>
    %cst_45 = arith.constant 5.000000e-01 : f32
    %132 = vector.broadcast %cst_45 : f32 to vector<8x128xf32>
    %133 = arith.addf %131, %132 : vector<8x128xf32>
    %134 = vector.extract_strided_slice %117 {offsets = [0, 256], sizes = [8, 128], strides = [1, 1]} : vector<8x512xf32> to vector<8x128xf32>
    %135 = math.tanh %134 : vector<8x128xf32>
    %136 = vector.extract_strided_slice %117 {offsets = [0, 384], sizes = [8, 128], strides = [1, 1]} : vector<8x512xf32> to vector<8x128xf32>
    %cst_46 = arith.constant 5.000000e-01 : f32
    %137 = vector.broadcast %cst_46 : f32 to vector<8x128xf32>
    %138 = arith.mulf %137, %136 : vector<8x128xf32>
    %139 = math.tanh %138 : vector<8x128xf32>
    %cst_47 = arith.constant 5.000000e-01 : f32
    %140 = vector.broadcast %cst_47 : f32 to vector<8x128xf32>
    %141 = arith.mulf %140, %139 : vector<8x128xf32>
    %cst_48 = arith.constant 5.000000e-01 : f32
    %142 = vector.broadcast %cst_48 : f32 to vector<8x128xf32>
    %143 = arith.addf %141, %142 : vector<8x128xf32>
    %144 = arith.mulf %133, %111 : vector<8x128xf32>
    %145 = arith.mulf %125, %135 : vector<8x128xf32>
    %146 = arith.addf %144, %145 : vector<8x128xf32>
    %147 = math.tanh %146 : vector<8x128xf32>
    %148 = arith.mulf %143, %147 : vector<8x128xf32>
    %149 = arith.truncf %148 : vector<8x128xf32> to vector<8x128xbf16>
    %cst_49 = arith.constant dense<0.000000e+00> : vector<8x512xf32>
    %150 = tpu.matmul %149, %1, %cst_49 {dimension_numbers = #tpu.dot_dimension_numbers<[1], [0], [0], [1], [0, 0, 1, 1], [], []>} : vector<8x128xbf16>, vector<128x512xbf16>, vector<8x512xf32> -> vector<8x512xf32>
    %151 = vector.extract_strided_slice %6 {offsets = [32, 0], sizes = [8, 512], strides = [1, 1]} : vector<64x512xf32> to vector<8x512xf32>
    %152 = arith.addf %150, %151 : vector<8x512xf32>
    %153 = vector.extract_strided_slice %152 {offsets = [0, 0], sizes = [8, 128], strides = [1, 1]} : vector<8x512xf32> to vector<8x128xf32>
    %cst_50 = arith.constant 5.000000e-01 : f32
    %154 = vector.broadcast %cst_50 : f32 to vector<8x128xf32>
    %155 = arith.mulf %154, %153 : vector<8x128xf32>
    %156 = math.tanh %155 : vector<8x128xf32>
    %cst_51 = arith.constant 5.000000e-01 : f32
    %157 = vector.broadcast %cst_51 : f32 to vector<8x128xf32>
    %158 = arith.mulf %157, %156 : vector<8x128xf32>
    %cst_52 = arith.constant 5.000000e-01 : f32
    %159 = vector.broadcast %cst_52 : f32 to vector<8x128xf32>
    %160 = arith.addf %158, %159 : vector<8x128xf32>
    %161 = vector.extract_strided_slice %152 {offsets = [0, 128], sizes = [8, 128], strides = [1, 1]} : vector<8x512xf32> to vector<8x128xf32>
    %cst_53 = arith.constant 5.000000e-01 : f32
    %162 = vector.broadcast %cst_53 : f32 to vector<8x128xf32>
    %163 = arith.mulf %162, %161 : vector<8x128xf32>
    %164 = math.tanh %163 : vector<8x128xf32>
    %cst_54 = arith.constant 5.000000e-01 : f32
    %165 = vector.broadcast %cst_54 : f32 to vector<8x128xf32>
    %166 = arith.mulf %165, %164 : vector<8x128xf32>
    %cst_55 = arith.constant 5.000000e-01 : f32
    %167 = vector.broadcast %cst_55 : f32 to vector<8x128xf32>
    %168 = arith.addf %166, %167 : vector<8x128xf32>
    %169 = vector.extract_strided_slice %152 {offsets = [0, 256], sizes = [8, 128], strides = [1, 1]} : vector<8x512xf32> to vector<8x128xf32>
    %170 = math.tanh %169 : vector<8x128xf32>
    %171 = vector.extract_strided_slice %152 {offsets = [0, 384], sizes = [8, 128], strides = [1, 1]} : vector<8x512xf32> to vector<8x128xf32>
    %cst_56 = arith.constant 5.000000e-01 : f32
    %172 = vector.broadcast %cst_56 : f32 to vector<8x128xf32>
    %173 = arith.mulf %172, %171 : vector<8x128xf32>
    %174 = math.tanh %173 : vector<8x128xf32>
    %cst_57 = arith.constant 5.000000e-01 : f32
    %175 = vector.broadcast %cst_57 : f32 to vector<8x128xf32>
    %176 = arith.mulf %175, %174 : vector<8x128xf32>
    %cst_58 = arith.constant 5.000000e-01 : f32
    %177 = vector.broadcast %cst_58 : f32 to vector<8x128xf32>
    %178 = arith.addf %176, %177 : vector<8x128xf32>
    %179 = arith.mulf %168, %146 : vector<8x128xf32>
    %180 = arith.mulf %160, %170 : vector<8x128xf32>
    %181 = arith.addf %179, %180 : vector<8x128xf32>
    %182 = math.tanh %181 : vector<8x128xf32>
    %183 = arith.mulf %178, %182 : vector<8x128xf32>
    %184 = arith.truncf %183 : vector<8x128xf32> to vector<8x128xbf16>
    %cst_59 = arith.constant dense<0.000000e+00> : vector<8x512xf32>
    %185 = tpu.matmul %184, %1, %cst_59 {dimension_numbers = #tpu.dot_dimension_numbers<[1], [0], [0], [1], [0, 0, 1, 1], [], []>} : vector<8x128xbf16>, vector<128x512xbf16>, vector<8x512xf32> -> vector<8x512xf32>
    %186 = vector.extract_strided_slice %6 {offsets = [40, 0], sizes = [8, 512], strides = [1, 1]} : vector<64x512xf32> to vector<8x512xf32>
    %187 = arith.addf %185, %186 : vector<8x512xf32>
    %188 = vector.extract_strided_slice %187 {offsets = [0, 0], sizes = [8, 128], strides = [1, 1]} : vector<8x512xf32> to vector<8x128xf32>
    %cst_60 = arith.constant 5.000000e-01 : f32
    %189 = vector.broadcast %cst_60 : f32 to vector<8x128xf32>
    %190 = arith.mulf %189, %188 : vector<8x128xf32>
    %191 = math.tanh %190 : vector<8x128xf32>
    %cst_61 = arith.constant 5.000000e-01 : f32
    %192 = vector.broadcast %cst_61 : f32 to vector<8x128xf32>
    %193 = arith.mulf %192, %191 : vector<8x128xf32>
    %cst_62 = arith.constant 5.000000e-01 : f32
    %194 = vector.broadcast %cst_62 : f32 to vector<8x128xf32>
    %195 = arith.addf %193, %194 : vector<8x128xf32>
    %196 = vector.extract_strided_slice %187 {offsets = [0, 128], sizes = [8, 128], strides = [1, 1]} : vector<8x512xf32> to vector<8x128xf32>
    %cst_63 = arith.constant 5.000000e-01 : f32
    %197 = vector.broadcast %cst_63 : f32 to vector<8x128xf32>
    %198 = arith.mulf %197, %196 : vector<8x128xf32>
    %199 = math.tanh %198 : vector<8x128xf32>
    %cst_64 = arith.constant 5.000000e-01 : f32
    %200 = vector.broadcast %cst_64 : f32 to vector<8x128xf32>
    %201 = arith.mulf %200, %199 : vector<8x128xf32>
    %cst_65 = arith.constant 5.000000e-01 : f32
    %202 = vector.broadcast %cst_65 : f32 to vector<8x128xf32>
    %203 = arith.addf %201, %202 : vector<8x128xf32>
    %204 = vector.extract_strided_slice %187 {offsets = [0, 256], sizes = [8, 128], strides = [1, 1]} : vector<8x512xf32> to vector<8x128xf32>
    %205 = math.tanh %204 : vector<8x128xf32>
    %206 = vector.extract_strided_slice %187 {offsets = [0, 384], sizes = [8, 128], strides = [1, 1]} : vector<8x512xf32> to vector<8x128xf32>
    %cst_66 = arith.constant 5.000000e-01 : f32
    %207 = vector.broadcast %cst_66 : f32 to vector<8x128xf32>
    %208 = arith.mulf %207, %206 : vector<8x128xf32>
    %209 = math.tanh %208 : vector<8x128xf32>
    %cst_67 = arith.constant 5.000000e-01 : f32
    %210 = vector.broadcast %cst_67 : f32 to vector<8x128xf32>
    %211 = arith.mulf %210, %209 : vector<8x128xf32>
    %cst_68 = arith.constant 5.000000e-01 : f32
    %212 = vector.broadcast %cst_68 : f32 to vector<8x128xf32>
    %213 = arith.addf %211, %212 : vector<8x128xf32>
    %214 = arith.mulf %203, %181 : vector<8x128xf32>
    %215 = arith.mulf %195, %205 : vector<8x128xf32>
    %216 = arith.addf %214, %215 : vector<8x128xf32>
    %217 = math.tanh %216 : vector<8x128xf32>
    %218 = arith.mulf %213, %217 : vector<8x128xf32>
    %219 = arith.truncf %218 : vector<8x128xf32> to vector<8x128xbf16>
    %cst_69 = arith.constant dense<0.000000e+00> : vector<8x512xf32>
    %220 = tpu.matmul %219, %1, %cst_69 {dimension_numbers = #tpu.dot_dimension_numbers<[1], [0], [0], [1], [0, 0, 1, 1], [], []>} : vector<8x128xbf16>, vector<128x512xbf16>, vector<8x512xf32> -> vector<8x512xf32>
    %221 = vector.extract_strided_slice %6 {offsets = [48, 0], sizes = [8, 512], strides = [1, 1]} : vector<64x512xf32> to vector<8x512xf32>
    %222 = arith.addf %220, %221 : vector<8x512xf32>
    %223 = vector.extract_strided_slice %222 {offsets = [0, 0], sizes = [8, 128], strides = [1, 1]} : vector<8x512xf32> to vector<8x128xf32>
    %cst_70 = arith.constant 5.000000e-01 : f32
    %224 = vector.broadcast %cst_70 : f32 to vector<8x128xf32>
    %225 = arith.mulf %224, %223 : vector<8x128xf32>
    %226 = math.tanh %225 : vector<8x128xf32>
    %cst_71 = arith.constant 5.000000e-01 : f32
    %227 = vector.broadcast %cst_71 : f32 to vector<8x128xf32>
    %228 = arith.mulf %227, %226 : vector<8x128xf32>
    %cst_72 = arith.constant 5.000000e-01 : f32
    %229 = vector.broadcast %cst_72 : f32 to vector<8x128xf32>
    %230 = arith.addf %228, %229 : vector<8x128xf32>
    %231 = vector.extract_strided_slice %222 {offsets = [0, 128], sizes = [8, 128], strides = [1, 1]} : vector<8x512xf32> to vector<8x128xf32>
    %cst_73 = arith.constant 5.000000e-01 : f32
    %232 = vector.broadcast %cst_73 : f32 to vector<8x128xf32>
    %233 = arith.mulf %232, %231 : vector<8x128xf32>
    %234 = math.tanh %233 : vector<8x128xf32>
    %cst_74 = arith.constant 5.000000e-01 : f32
    %235 = vector.broadcast %cst_74 : f32 to vector<8x128xf32>
    %236 = arith.mulf %235, %234 : vector<8x128xf32>
    %cst_75 = arith.constant 5.000000e-01 : f32
    %237 = vector.broadcast %cst_75 : f32 to vector<8x128xf32>
    %238 = arith.addf %236, %237 : vector<8x128xf32>
    %239 = vector.extract_strided_slice %222 {offsets = [0, 256], sizes = [8, 128], strides = [1, 1]} : vector<8x512xf32> to vector<8x128xf32>
    %240 = math.tanh %239 : vector<8x128xf32>
    %241 = vector.extract_strided_slice %222 {offsets = [0, 384], sizes = [8, 128], strides = [1, 1]} : vector<8x512xf32> to vector<8x128xf32>
    %cst_76 = arith.constant 5.000000e-01 : f32
    %242 = vector.broadcast %cst_76 : f32 to vector<8x128xf32>
    %243 = arith.mulf %242, %241 : vector<8x128xf32>
    %244 = math.tanh %243 : vector<8x128xf32>
    %cst_77 = arith.constant 5.000000e-01 : f32
    %245 = vector.broadcast %cst_77 : f32 to vector<8x128xf32>
    %246 = arith.mulf %245, %244 : vector<8x128xf32>
    %cst_78 = arith.constant 5.000000e-01 : f32
    %247 = vector.broadcast %cst_78 : f32 to vector<8x128xf32>
    %248 = arith.addf %246, %247 : vector<8x128xf32>
    %249 = arith.mulf %238, %216 : vector<8x128xf32>
    %250 = arith.mulf %230, %240 : vector<8x128xf32>
    %251 = arith.addf %249, %250 : vector<8x128xf32>
    %252 = math.tanh %251 : vector<8x128xf32>
    %253 = arith.mulf %248, %252 : vector<8x128xf32>
    %254 = arith.truncf %253 : vector<8x128xf32> to vector<8x128xbf16>
    %cst_79 = arith.constant dense<0.000000e+00> : vector<8x512xf32>
    %255 = tpu.matmul %254, %1, %cst_79 {dimension_numbers = #tpu.dot_dimension_numbers<[1], [0], [0], [1], [0, 0, 1, 1], [], []>} : vector<8x128xbf16>, vector<128x512xbf16>, vector<8x512xf32> -> vector<8x512xf32>
    %256 = vector.extract_strided_slice %6 {offsets = [56, 0], sizes = [8, 512], strides = [1, 1]} : vector<64x512xf32> to vector<8x512xf32>
    %257 = arith.addf %255, %256 : vector<8x512xf32>
    %258 = vector.extract_strided_slice %257 {offsets = [0, 0], sizes = [8, 128], strides = [1, 1]} : vector<8x512xf32> to vector<8x128xf32>
    %cst_80 = arith.constant 5.000000e-01 : f32
    %259 = vector.broadcast %cst_80 : f32 to vector<8x128xf32>
    %260 = arith.mulf %259, %258 : vector<8x128xf32>
    %261 = math.tanh %260 : vector<8x128xf32>
    %cst_81 = arith.constant 5.000000e-01 : f32
    %262 = vector.broadcast %cst_81 : f32 to vector<8x128xf32>
    %263 = arith.mulf %262, %261 : vector<8x128xf32>
    %cst_82 = arith.constant 5.000000e-01 : f32
    %264 = vector.broadcast %cst_82 : f32 to vector<8x128xf32>
    %265 = arith.addf %263, %264 : vector<8x128xf32>
    %266 = vector.extract_strided_slice %257 {offsets = [0, 128], sizes = [8, 128], strides = [1, 1]} : vector<8x512xf32> to vector<8x128xf32>
    %cst_83 = arith.constant 5.000000e-01 : f32
    %267 = vector.broadcast %cst_83 : f32 to vector<8x128xf32>
    %268 = arith.mulf %267, %266 : vector<8x128xf32>
    %269 = math.tanh %268 : vector<8x128xf32>
    %cst_84 = arith.constant 5.000000e-01 : f32
    %270 = vector.broadcast %cst_84 : f32 to vector<8x128xf32>
    %271 = arith.mulf %270, %269 : vector<8x128xf32>
    %cst_85 = arith.constant 5.000000e-01 : f32
    %272 = vector.broadcast %cst_85 : f32 to vector<8x128xf32>
    %273 = arith.addf %271, %272 : vector<8x128xf32>
    %274 = vector.extract_strided_slice %257 {offsets = [0, 256], sizes = [8, 128], strides = [1, 1]} : vector<8x512xf32> to vector<8x128xf32>
    %275 = math.tanh %274 : vector<8x128xf32>
    %276 = vector.extract_strided_slice %257 {offsets = [0, 384], sizes = [8, 128], strides = [1, 1]} : vector<8x512xf32> to vector<8x128xf32>
    %cst_86 = arith.constant 5.000000e-01 : f32
    %277 = vector.broadcast %cst_86 : f32 to vector<8x128xf32>
    %278 = arith.mulf %277, %276 : vector<8x128xf32>
    %279 = math.tanh %278 : vector<8x128xf32>
    %cst_87 = arith.constant 5.000000e-01 : f32
    %280 = vector.broadcast %cst_87 : f32 to vector<8x128xf32>
    %281 = arith.mulf %280, %279 : vector<8x128xf32>
    %cst_88 = arith.constant 5.000000e-01 : f32
    %282 = vector.broadcast %cst_88 : f32 to vector<8x128xf32>
    %283 = arith.addf %281, %282 : vector<8x128xf32>
    %284 = arith.mulf %273, %251 : vector<8x128xf32>
    %285 = arith.mulf %265, %275 : vector<8x128xf32>
    %286 = arith.addf %284, %285 : vector<8x128xf32>
    %287 = math.tanh %286 : vector<8x128xf32>
    %288 = arith.mulf %283, %287 : vector<8x128xf32>
    %c0_89 = arith.constant 0 : index
    %c0_90 = arith.constant 0 : index
    %289 = vector.load %arg5[%c0_89, %c0_90] : memref<8x128xf32, #tpu.memory_space<vmem>>, vector<8x128xf32>
    tpu.vector_store %arg5[%c0_89, %c0_90], %288 {strides = array<i32>} : memref<8x128xf32, #tpu.memory_space<vmem>>, vector<8x128xf32>,
    return
  }
  func.func @transform_0(%arg0: i32) -> (i32, i32) {
    %c0_i32 = arith.constant 0 : i32
    %c0_i32_0 = arith.constant 0 : i32
    return %arg0, %c0_i32 : i32, i32
  }
  func.func @transform_1(%arg0: i32) -> (i32, i32) {
    %c0_i32 = arith.constant 0 : i32
    %c0_i32_0 = arith.constant 0 : i32
    %c0_i32_1 = arith.constant 0 : i32
    return %c0_i32, %c0_i32_0 : i32, i32
  }
  func.func @transform_2(%arg0: i32) -> (i32, i32) {
    %c0_i32 = arith.constant 0 : i32
    %c0_i32_0 = arith.constant 0 : i32
    %c0_i32_1 = arith.constant 0 : i32
    return %c0_i32, %c0_i32_0 : i32, i32
  }
  func.func @transform_3(%arg0: i32) -> (i32, i32) {
    %c0_i32 = arith.constant 0 : i32
    %c0_i32_0 = arith.constant 0 : i32
    %c0_i32_1 = arith.constant 0 : i32
    return %c0_i32, %c0_i32_0 : i32, i32
  }
  func.func @transform_4(%arg0: i32) -> (i32, i32) {
    %c0_i32 = arith.constant 0 : i32
    %c0_i32_0 = arith.constant 0 : i32
    return %arg0, %c0_i32 : i32, i32
  }
}

</mosaic_0001>

<bundles_post_ra>
// kernel: tpu_custom_call.1
= control target key start
LH: loop header
LB: loop body
LE: loop exit
PB: predicated region body
PF: predicated region fallthrough
CT: control target
= control target key end

     0   :  { %9 = vsyncpa [#allocation3], 0  ;;  %s2542_s0 = inlined_call_operand.vmem [shape: bf16[128,64], index: 0, kind: input, shape index: {}]   ;;  %s2543_s1 = inlined_call_operand.hbm [shape: bf16[64,512], index: 1, kind: input, shape index: {}]   ;;  %s2544_s2 = inlined_call_operand.hbm [shape: bf16[128,512], index: 2, kind: input, shape index: {}]   ;;  %s2545_s3 = inlined_call_operand.vmem [shape: f32[1,512], index: 3, kind: input, shape index: {}]   ;;  %s2546_s4 = inlined_call_operand.hbm [shape: f32[16,128], index: 4, kind: output, shape index: {}]  }
   0x1   :  { %10 = vsyncpa [#allocation6], 0 }
   0x2   :  { %11 = vsyncpa [#allocation4], 0 }
   0x3   :  { %13 = vsyncpa [#allocation4 + $0x1], 0  ;;  %s1949_s15 = smov 0   ;;  %s1951_s16 = smov 0  }
   0x4   :  { %s1953_s17 = smov 0   ;;  %s1955_s18 = smov 0  }
   0x5 LB: > { %s1970_s19 = sadd.s32 4294967295, %s1917_s18   ;;  %s1353_s20 = sadd.s32 4294967294, %s1917_s18   ;;  %s1917_s18 = sphi %s1955_s18, %s2587_s18   ;;  %s1913_s17 = sphi %s1953_s17, %s2586_s17   ;;  %s1909_s16 = sphi %s1951_s16, %s2585_s16   ;;  %s1905_s15 = sphi %s1949_s15, %s2584_s15  }
   0x6   : > { %s1974_s21 = sadd.s32 1, %s1917_s18   ;;  %s115_s22 = sadd.s32 1, %s1913_s17 }
   0x7   : > { %s112_s23 = ssub.s32 %s1917_s18, %s1974_s21  ;;  %p125_p0 = scmp.ne.s32.totalorder %s1913_s17, %s1909_s16 }
   0x8   : > { %p113_p1 = scmp.eq.s32.totalorder %s112_s23, 0  ;;  %p126_p2 = scmp.eq.s32.totalorder %s1970_s19, 1 }
   0x9   : > { %p131_p3 = scmp.ne.s32.totalorder %s1909_s16, %s1905_s15  ;;  %p132_p4 = scmp.eq.s32.totalorder %s1353_s20, 1 }
   0xa   : > { %s1985_s24 = scalar_select %p113_p1, %s1913_s17, %s115_s22  }
   0xb   : > { %p1987_p5 = por %p126_p2, %p125_p0  ;;  %p1991_p6 = por %p132_p4, %p131_p3 }
   0xc   : > { %p1354_p7 = scmp.ge.s32.totalorder %s1917_s18, 1  ;;  %p139_p8 = scmp.lt.s32.totalorder %s1917_s18, 3 }
   0xd   : > { %p1665_p9 = scmp.eq.s32.totalorder %s1970_s19, 0  ;;  %s150_s30 = sshll.u32 %s2543_s1, 4  ;;  %s151_s30 = int_to_ptr.hbm [resolvable:$true] %s150_s30 }
   0xe   : > { %p1998_p10 = pnand %p1354_p7, %p139_p8  ;;  %s1919_s5 = smov [#allocation2]  }
   0xf   : > { %s152_s6 = sshll.u32 %s1919_s5, 4  ;;  %s164_s9 = sshll.u32 %s2544_s2, 4  ;;  %s153_s6 = int_to_ptr.vmem [resolvable:$true] %s152_s6  ;;  %s165_s9 = int_to_ptr.hbm [resolvable:$true] %s164_s9 }
  0x10   : > { %p1654_p11 = pneg %p1998_p10  ;;  %s1920_s10 = smov 256  }
  0x11   : > { %s1921_s11 = smov 16   ;;  %s1922_s12 = smov [#allocation5]  }
  0x12   : > { %p1655_p12 = pnand %p1665_p9, %p1654_p11  ;;  %s166_s13 = sshll.u32 %s1922_s12, 4  ;;  %s167_s13 = int_to_ptr.vmem [resolvable:$true] %s166_s13 }
  0x13   : > { %194 = sbr.rel (%p1998_p10) target bundleno = 1368 (0x558), region = 36 }
  0x14   : > { %1657 = dma.hbm_to_vmem [thread:$0]  (!%p1655_p12), %s151_s30, 2048, %s153_s6, [#allocation3], %s1920_s10, %s1920_s10, %s1921_s11  }
  0x15   : > { %1660 = dma.hbm_to_vmem [thread:$0]  (!%p1655_p12), %s165_s9, 4096, %s167_s13, [#allocation6], %s1920_s10, %s1920_s10, %s1921_s11  }
  0x18   : > { %1892 = dma.done.wait (%p1665_p9), [#allocation3], 2048  }
  0x19   : > { %1894 = vsyncadd (%p1665_p9), [#allocation3], 4294965248 }
  0x1a   : > { %1896 = dma.done.wait (%p1665_p9), [#allocation6], 4096  }
  0x1b   : > { %1898 = vsyncadd (%p1665_p9), [#allocation6], 4294963200  ;;  %s2023_s14 = sshll.u32 %s1970_s19, 3  ;;  %v1430_v0 = vld [vmem:[#allocation2 + $0x60] sm:$0xf]  ;;  %vm399_vm0 = vcmask 523264  }
  0x1c   : > { %p227_p13 = scmp.lt.s32.totalorder %s2023_s14, 15  ;;  %v1606_v1 = vld [vmem:[#allocation2 + $0x6c] sm:$0xf0]  ;;  %v1604_v2 = vld [vmem:[#allocation2 + $0x64] sm:$0xf]  ;;  %s223_s30 = sand.u32 1, %s1909_s16  }
  0x1d   : > { %v1431_v3 = vor.u32 %v1606_v1, %v1430_v0  ;;  %v1432_v4 = vld [vmem:[#allocation2 + $0x70] sm:$0xf0]  ;;  %v1438_v5 = vld [vmem:[#allocation2 + $0x68] sm:$0xf]  ;;  %v1607_v6 = vld [vmem:[#allocation2 + $0x74] sm:$0xf0]  ;;  %s1267_s8 = scalar_lea.hbm %s2546_s4, %s2023_s14 }
  0x1e   : > { %s2027_s20 = scalar_select %p227_p13, %s2023_s14, 15  ;;  %v1435_v7 = vor.u32 %v1604_v2, %v1432_v4  ;;  %v1439_v8 = vor.u32 %v1607_v6, %v1438_v5  ;;  %v1605_v9 = vld [vmem:[#allocation2 + $0x6c] sm:$0xf]  ;;  %v1440_v10 = vld [vmem:[#allocation2 + $0x78] sm:$0xf0] }
  0x1f   : > { %v1414_v11 = vld [vmem:[#allocation2 + $0x40] sm:$0xf]  ;;  %416 = vmatpush.bf16.msra.mxu0 %v1431_v3  ;;  %v1443_v12 = vor.u32 %v1605_v9, %v1440_v10  ;;  %v1602_v13 = vld [vmem:[#allocation2 + $0x4c] sm:$0xf0]  ;;  %v1600_v14 = vld [vmem:[#allocation2 + $0x44] sm:$0xf] }
  0x20   : > { %s1363_s22 = sshll.u32 %s2027_s20, 2  ;;  %v1416_v15 = vld [vmem:[#allocation2 + $0x50] sm:$0xf0]  ;;  %445 = vmatpush.bf16.msra.mxu1 %v1435_v7  ;;  %474 = vmatpush.bf16.msra.mxu2 %v1439_v8  ;;  %v1415_v16 = vor.u32 %v1602_v13, %v1414_v11  ;;  %v1422_v18 = vld [vmem:[#allocation2 + $0x48] sm:$0xf]  ;;  %s1361_s5 = sshll.u32 %s223_s30, 3 }
  0x21   : > { %v1419_v17 = vor.u32 %v1600_v14, %v1416_v15  ;;  %v1603_v19 = vld [vmem:[#allocation2 + $0x54] sm:$0xf0]  ;;  %v1601_v20 = vld [vmem:[#allocation2 + $0x4c] sm:$0xf]  ;;  %503 = vmatpush.bf16.msra.mxu3 %v1443_v12  ;;  %v1424_v22 = vld [vmem:[#allocation2 + $0x58] sm:$0xf0]  ;;  %s2035_s27 = scalar_lea.vmem %s2542_s0, %s1363_s22 }
  0x22   : > { %v1423_v21 = vor.u32 %v1603_v19, %v1422_v18  ;;  %v1398_v23 = vld [vmem:[#allocation2 + $0x20] sm:$0xf]  ;;  %v1598_v24 = vld [vmem:[#allocation2 + $0x2c] sm:$0xf0]  ;;  %v1427_v25 = vor.u32 %v1601_v20, %v1424_v22  ;;  %v1596_v26 = vld [vmem:[#allocation2 + $0x24] sm:$0xf] }
  0x23   : > { %v1400_v27 = vld [vmem:[#allocation2 + $0x30] sm:$0xf0]  ;;  %v1406_v28 = vld [vmem:[#allocation2 + $0x28] sm:$0xf]  ;;  %417 = vmatpush.bf16.msra.mxu0 %v1415_v16  ;;  %v1399_v29 = vor.u32 %v1598_v24, %v1398_v23  ;;  %v1599_v30 = vld [vmem:[#allocation2 + $0x34] sm:$0xf0] }
  0x24   : > { %v1597_v31 = vld [vmem:[#allocation2 + $0x2c] sm:$0xf]  ;;  %v1408_v32 = vld [vmem:[#allocation2 + $0x38] sm:$0xf0]  ;;  %446 = vmatpush.bf16.msra.mxu1 %v1419_v17  ;;  %475 = vmatpush.bf16.msra.mxu2 %v1423_v21  ;;  %v1403_v33 = vor.u32 %v1596_v26, %v1400_v27  ;;  %v1407_v34 = vor.u32 %v1599_v30, %v1406_v28  ;;  %v1382_v35 = vld [vmem:[#allocation2] sm:$0xf] }
  0x25   : > { %v1594_v36 = vld [vmem:[#allocation2 + $0xc] sm:$0xf0]  ;;  %v1592_v37 = vld [vmem:[#allocation2 + $0x4] sm:$0xf]  ;;  %504 = vmatpush.bf16.msra.mxu3 %v1427_v25  ;;  %v1411_v38 = vor.u32 %v1597_v31, %v1408_v32  ;;  %v1384_v39 = vld [vmem:[#allocation2 + $0x10] sm:$0xf0] }
  0x26   : > { %v1390_v40 = vld [vmem:[#allocation2 + $0x8] sm:$0xf]  ;;  %v1595_v41 = vld [vmem:[#allocation2 + $0x14] sm:$0xf0]  ;;  %v1593_v42 = vld [vmem:[#allocation2 + $0xc] sm:$0xf]  ;;  %v1383_v44 = vor.u32 %v1594_v36, %v1382_v35  ;;  %v1387_v48 = vor.u32 %v1592_v37, %v1384_v39 }
  0x27   : > { %v1392_v43 = vld [vmem:[#allocation2 + $0x18] sm:$0xf0]  ;;  %418 = vmatpush.bf16.msra.mxu0 %v1399_v29  ;;  %v1574_v45 = vld [vmem:[#allocation5 + $0xe0] sm:$0xf]  ;;  %v1638_v46 = vld [vmem:[#allocation5 + $0xec] sm:$0xf0]  ;;  %v1391_v49 = vor.u32 %v1595_v41, %v1390_v40 }
  0x28   : > { %v1636_v47 = vld [vmem:[#allocation5 + $0xe4] sm:$0xf]  ;;  %447 = vmatpush.bf16.msra.mxu1 %v1403_v33  ;;  %476 = vmatpush.bf16.msra.mxu2 %v1407_v34  ;;  %v1576_v51 = vld [vmem:[#allocation5 + $0xf0] sm:$0xf0]  ;;  %v1395_v52 = vor.u32 %v1593_v42, %v1392_v43  ;;  %v2038_v53 = vor.u32 %v1638_v46, %v1574_v45  ;;  %v1582_v54 = vld [vmem:[#allocation5 + $0xe8] sm:$0xf] }
  0x29   : > { %v1640_v50 = vld [vmem:[%s2035_s27] sm:$0xff]  ;;  %505 = vmatpush.bf16.msra.mxu3 %v1411_v38  ;;  %v1639_v55 = vld [vmem:[#allocation5 + $0xf4] sm:$0xf0]  ;;  %v1637_v56 = vld [vmem:[#allocation5 + $0xec] sm:$0xf]  ;;  %v2040_v57 = vor.u32 %v1636_v47, %v1576_v51  ;;  %s225_s9 = scalar_lea.vmem [#allocation7], %s1361_s5 }
  0x2a   : > { %v1584_v58 = vld [vmem:[#allocation5 + $0xf8] sm:$0xf0]  ;;  %v1558_v59 = vld [vmem:[#allocation5 + $0xc0] sm:$0xf]  ;;  %v1634_v60 = vld [vmem:[#allocation5 + $0xcc] sm:$0xf0]  ;;  %v2042_v63 = vor.u32 %v1639_v55, %v1582_v54 }
  0x2b   : > { %419 = vmatpush.bf16.msra.mxu0 %v1383_v44  ;;  %v1632_v61 = vld [vmem:[#allocation5 + $0xc4] sm:$0xf]  ;;  %v1560_v62 = vld [vmem:[#allocation5 + $0xd0] sm:$0xf0]  ;;  %v2045_v0 = vor.u32 %v1637_v56, %v1584_v58  ;;  %v2047_v1 = vor.u32 %v1634_v60, %v1558_v59  ;;  %v1566_v2 = vld [vmem:[#allocation5 + $0xc8] sm:$0xf] }
  0x2c   : > { %448 = vmatpush.bf16.msra.mxu1 %v1387_v48  ;;  %477 = vmatpush.bf16.msra.mxu2 %v1391_v49  ;;  %v1635_v3 = vld [vmem:[#allocation5 + $0xd4] sm:$0xf0]  ;;  %v1633_v4 = vld [vmem:[#allocation5 + $0xcc] sm:$0xf]  ;;  %v2051_v5 = vor.u32 %v1632_v61, %v1560_v62  ;;  %v1568_v6 = vld [vmem:[#allocation5 + $0xd8] sm:$0xf0] }
  0x2d   : > { %506 = vmatpush.bf16.msra.mxu3 %v1395_v52  ;;  %v1542_v7 = vld [vmem:[#allocation5 + $0xa0] sm:$0xf]  ;;  %v1630_v8 = vld [vmem:[#allocation5 + $0xac] sm:$0xf0]  ;;  %v1628_v9 = vld [vmem:[#allocation5 + $0xa4] sm:$0xf]  ;;  %v2057_v11 = vor.u32 %v1635_v3, %v1566_v2  ;;  %v2061_v12 = vor.u32 %v1633_v4, %v1568_v6 }
  0x2e   : > { %1444 = vmatmul.msk.bf16.vlgmr.msra.gmra.mxu0 %vm399_vm0, %v1640_v50  ;;  %v1544_v10 = vld [vmem:[#allocation5 + $0xb0] sm:$0xf0]  ;;  %v2063_v13 = vor.u32 %v1630_v8, %v1542_v7  ;;  %v1550_v14 = vld [vmem:[#allocation5 + $0xa8] sm:$0xf]  ;;  %v1631_v15 = vld [vmem:[#allocation5 + $0xb4] sm:$0xf0] }
  0x2f   : > { %688 = vmatpush.bf16.msrb.mxu0 %v2038_v53  ;;  %1448 = vmatmul.msk.bf16.vlgmr.msra.gmra.mxu1 %vm399_vm0, %v1640_v50  ;;  %v1629_v16 = vld [vmem:[#allocation5 + $0xac] sm:$0xf]  ;;  %v2066_v17 = vor.u32 %v1628_v9, %v1544_v10  ;;  %v1552_v18 = vld [vmem:[#allocation5 + $0xb8] sm:$0xf0]  ;;  %v1526_v19 = vld [vmem:[#allocation5 + $0x80] sm:$0xf]  ;;  %v2069_v23 = vor.u32 %v1631_v15, %v1550_v14 }
  0x30   : > { %701 = vmatpush.bf16.msrb.mxu1 %v2040_v57  ;;  %1452 = vmatmul.msk.bf16.vlgmr.msra.gmra.mxu2 %vm399_vm0, %v1640_v50  ;;  %v1626_v20 = vld [vmem:[#allocation5 + $0x8c] sm:$0xf0]  ;;  %v1624_v21 = vld [vmem:[#allocation5 + $0x84] sm:$0xf]  ;;  %v1528_v22 = vld [vmem:[#allocation5 + $0x90] sm:$0xf0]  ;;  %v2073_v24 = vor.u32 %v1629_v16, %v1552_v18 }
  0x31   : > { %1456 = vmatmul.msk.bf16.vlgmr.msra.gmra.mxu3 %vm399_vm0, %v1640_v50  ;;  %714 = vmatpush.bf16.msrb.mxu2 %v2042_v63  ;;  %v2075_v25 = vor.u32 %v1626_v20, %v1526_v19  ;;  %v1534_v26 = vld [vmem:[#allocation5 + $0x88] sm:$0xf]  ;;  %v1627_v27 = vld [vmem:[#allocation5 + $0x94] sm:$0xf0]  ;;  %v1625_v28 = vld [vmem:[#allocation5 + $0x8c] sm:$0xf]  ;;  %v2078_v29 = vor.u32 %v1624_v21, %v1528_v22 }
  0x32   : > { %727 = vmatpush.bf16.msrb.mxu3 %v2045_v0  ;;  %v1536_v30 = vld [vmem:[#allocation5 + $0x98] sm:$0xf0]  ;;  %v1510_v31 = vld [vmem:[#allocation5 + $0x60] sm:$0xf]  ;;  %v1622_v32 = vld [vmem:[#allocation5 + $0x6c] sm:$0xf0]  ;;  %v2082_v36 = vor.u32 %v1627_v27, %v1534_v26 }
  0x33   : > { %689 = vmatpush.bf16.msrb.mxu0 %v2047_v1  ;;  %v1620_v33 = vld [vmem:[#allocation5 + $0x64] sm:$0xf]  ;;  %v1512_v34 = vld [vmem:[#allocation5 + $0x70] sm:$0xf0]  ;;  %v1641_v35 = vld [vmem:[%s2035_s27 + $0x8] sm:$0xff]  ;;  %v2086_v37 = vor.u32 %v1625_v28, %v1536_v30  ;;  %v2088_v38 = vor.u32 %v1622_v32, %v1510_v31  ;;  %s1269_s10 = sshll.u32 %s225_s9, 4  ;;  %s1270_s10 = int_to_ptr.vmem [resolvable:$true] %s1269_s10 }
  0x34   : > { %702 = vmatpush.bf16.msrb.mxu1 %v2051_v5  ;;  %v1518_v39 = vld [vmem:[#allocation5 + $0x68] sm:$0xf]  ;;  %v1623_v40 = vld [vmem:[#allocation5 + $0x74] sm:$0xf0]  ;;  %v1621_v41 = vld [vmem:[#allocation5 + $0x6c] sm:$0xf]  ;;  %v2091_v42 = vor.u32 %v1620_v33, %v1512_v34 }
  0x35   : > { %715 = vmatpush.bf16.msrb.mxu2 %v2057_v11  ;;  %v1520_v43 = vld [vmem:[#allocation5 + $0x78] sm:$0xf0]  ;;  %v1494_v44 = vld [vmem:[#allocation5 + $0x40] sm:$0xf]  ;;  %v1618_v45 = vld [vmem:[#allocation5 + $0x4c] sm:$0xf0]  ;;  %v2094_v48 = vor.u32 %v1623_v40, %v1518_v39 }
  0x36   : > { %728 = vmatpush.bf16.msrb.mxu3 %v2061_v12  ;;  %v1616_v46 = vld [vmem:[#allocation5 + $0x44] sm:$0xf]  ;;  %v1496_v47 = vld [vmem:[#allocation5 + $0x50] sm:$0xf0]  ;;  %v2098_v49 = vor.u32 %v1621_v41, %v1520_v43  ;;  %v2100_v50 = vor.u32 %v1618_v45, %v1494_v44  ;;  %v1502_v51 = vld [vmem:[#allocation5 + $0x48] sm:$0xf] }
  0x37   : > { %690 = vmatpush.bf16.msrb.mxu0 %v2063_v13  ;;  %v1619_v52 = vld [vmem:[#allocation5 + $0x54] sm:$0xf0]  ;;  %v2104_v54 = vor.u32 %v1616_v46, %v1496_v47  ;;  %v1617_v55 = vld [vmem:[#allocation5 + $0x4c] sm:$0xf]  ;;  %v1504_v56 = vld [vmem:[#allocation5 + $0x58] sm:$0xf0] }
  0x38   : > { %703 = vmatpush.bf16.msrb.mxu1 %v2066_v17  ;;  %v2110_v58 = vor.u32 %v1619_v52, %v1502_v51  ;;  %v1478_v59 = vld [vmem:[#allocation5 + $0x20] sm:$0xf]  ;;  %v1614_v60 = vld [vmem:[#allocation5 + $0x2c] sm:$0xf0]  ;;  %v1612_v61 = vld [vmem:[#allocation5 + $0x24] sm:$0xf]  ;;  %v2114_v62 = vor.u32 %v1617_v55, %v1504_v56 }
  0x39   : > { %716 = vmatpush.bf16.msrb.mxu2 %v2069_v23  ;;  %v2116_v2 = vor.u32 %v1614_v60, %v1478_v59  ;;  %v1480_v3 = vld [vmem:[#allocation5 + $0x30] sm:$0xf0]  ;;  %v1486_v4 = vld [vmem:[#allocation5 + $0x28] sm:$0xf]  ;;  %v1615_v6 = vld [vmem:[#allocation5 + $0x34] sm:$0xf0] }
  0x3a   : > { %729 = vmatpush.bf16.msrb.mxu3 %v2073_v24  ;;  %v2119_v7 = vor.u32 %v1612_v61, %v1480_v3  ;;  %v1613_v8 = vld [vmem:[#allocation5 + $0x2c] sm:$0xf]  ;;  %v1488_v9 = vld [vmem:[#allocation5 + $0x38] sm:$0xf0]  ;;  %v1462_v10 = vld [vmem:[#allocation5] sm:$0xf]  ;;  %v2122_v18 = vor.u32 %v1615_v6, %v1486_v4 }
  0x3b   : > { %691 = vmatpush.bf16.msrb.mxu0 %v2075_v25  ;;  %v1610_v14 = vld [vmem:[#allocation5 + $0xc] sm:$0xf0]  ;;  %v1608_v15 = vld [vmem:[#allocation5 + $0x4] sm:$0xf]  ;;  %v1464_v16 = vld [vmem:[#allocation5 + $0x10] sm:$0xf0]  ;;  %v2126_v19 = vor.u32 %v1613_v8, %v1488_v9 }
  0x3c   : > { %704 = vmatpush.bf16.msrb.mxu1 %v2078_v29  ;;  %v2128_v20 = vor.u32 %v1610_v14, %v1462_v10  ;;  %v1470_v21 = vld [vmem:[#allocation5 + $0x8] sm:$0xf]  ;;  %v1611_v22 = vld [vmem:[#allocation5 + $0x14] sm:$0xf0]  ;;  %v2131_v26 = vor.u32 %v1608_v15, %v1464_v16  ;;  %v1609_v27 = vld [vmem:[#allocation5 + $0xc] sm:$0xf] }
  0x3d   : > { %717 = vmatpush.bf16.msrb.mxu2 %v2082_v36  ;;  %v1472_v28 = vld [vmem:[#allocation5 + $0x18] sm:$0xf0]  ;;  %v2134_v30 = vor.u32 %v1611_v22, %v1470_v21  ;;  %v1642_v32 = vld [vmem:[%s2035_s27 + $0x10] sm:$0xff]  ;;  %v1923_v34 = vmov 0   ;;  %v289_v40 = vld [vmem:[%s2545_s3] sm:$0xf] }
  0x3e   : > { %730 = vmatpush.bf16.msrb.mxu3 %v2086_v37  ;;  %1445 = vmatmul.msk.bf16.gmra.mxu0 %vm399_vm0, %v1641_v35  ;;  %v2138_v31 = vor.u32 %v1609_v27, %v1472_v28  ;;  %v1643_v33 = vld [vmem:[%s2035_s27 + $0x18] sm:$0xff]  ;;  %v291_v41 = vperm.slane %v289_v40, 0  ;;  %v292_v44 = vperm.slane %v289_v40, 1  ;;  %v2228_v55 = vperm.slane %v289_v40, 2  ;;  %s1271_s11 = sshll.u32 %s1267_s8, 4  ;;  %s1257_s12 = scalar_lea.sflag [#allocation4], %s223_s30  ;;  %s1272_s11 = int_to_ptr.hbm [resolvable:$true] %s1271_s11 }
  0x3f   : > { %692 = vmatpush.bf16.msrb.mxu0 %v2088_v38  ;;  %1449 = vmatmul.msk.bf16.gmra.mxu1 %vm399_vm0, %v1641_v35  ;;  %v2230_v56 = vperm.slane %v289_v40, 3  ;;  %s1861_s13 = sshra.s32 %s1272_s11, 4  ;;  %s1867_s14 = scalar_lea.hbm %s2546_s4, 16  ;;  %s1862_s13 = int_to_ptr.hbm [resolvable:$true] %s1861_s13 }
  0x40   : > { %705 = vmatpush.bf16.msrb.mxu1 %v2091_v42  ;;  %1453 = vmatmul.msk.bf16.gmra.mxu2 %vm399_vm0, %v1641_v35  ;;  %s1863_s20 = scalar_lea.hbm %s1862_s13, 8  ;;  %p1868_p3 = scmp.lt.s32.totalorder %s1862_s13, %s2546_s4 }
  0x41   : > { %1457 = vmatmul.msk.bf16.gmra.mxu3 %vm399_vm0, %v1641_v35  ;;  %718 = vmatpush.bf16.msrb.mxu2 %v2094_v48  ;;  %p1864_p0 = scmp.ne.s32.totalorder %s1862_s13, %s1863_s20  ;;  %p1869_p4 = scmp.lt.s32.totalorder %s1867_s14, %s1863_s20 }
  0x42   : > { %731 = vmatpush.bf16.msrb.mxu3 %v2098_v49 }
  0x43   : > { %693 = vmatpush.bf16.msrb.mxu0 %v2100_v50  ;;  %p1865_p1 = pnand %p1864_p0, %p1987_p5  ;;  %p1870_p7 = por %p1869_p4, %p1868_p3 }
  0x44   : > { %706 = vmatpush.bf16.msrb.mxu1 %v2104_v54 }
  0x45   : > { %719 = vmatpush.bf16.msrb.mxu2 %v2110_v58  ;;  %p1866_p2 = pneg %p1865_p1 }
  0x46   : > { %732 = vmatpush.bf16.msrb.mxu3 %v2114_v62 }
  0x47   : > { %694 = vmatpush.bf16.msrb.mxu0 %v2116_v2  ;;  %p1871_p8 = pnand %p1870_p7, %p1866_p2 }
  0x48   : > { %707 = vmatpush.bf16.msrb.mxu1 %v2119_v7 }
  0x49   : > { %720 = vmatpush.bf16.msrb.mxu2 %v2122_v18 }
  0x4a   : > { %733 = vmatpush.bf16.msrb.mxu3 %v2126_v19 }
  0x4b   : > { %695 = vmatpush.bf16.msrb.mxu0 %v2128_v20 }
  0x4c   : > { %708 = vmatpush.bf16.msrb.mxu1 %v2131_v26 }
  0x4d   : > { %721 = vmatpush.bf16.msrb.mxu2 %v2134_v30 }
  0x4e   : > { %734 = vmatpush.bf16.msrb.mxu3 %v2138_v31  ;;  %1446 = vmatmul.msk.bf16.gmra.mxu0 %vm399_vm0, %v1642_v32 }
  0x4f   : > { %759 = vmatpush.bf16.msra.mxu0 %v2038_v53  ;;  %1450 = vmatmul.msk.bf16.gmra.mxu1 %vm399_vm0, %v1642_v32 }
  0x50   : > { %772 = vmatpush.bf16.msra.mxu1 %v2040_v57  ;;  %1454 = vmatmul.msk.bf16.gmra.mxu2 %vm399_vm0, %v1642_v32 }
  0x51   : > { %785 = vmatpush.bf16.msra.mxu2 %v2042_v63  ;;  %1458 = vmatmul.msk.bf16.gmra.mxu3 %vm399_vm0, %v1642_v32 }
  0x52   : > { %798 = vmatpush.bf16.msra.mxu3 %v2045_v0 }
  0x53   : > { %760 = vmatpush.bf16.msra.mxu0 %v2047_v1 }
  0x54   : > { %773 = vmatpush.bf16.msra.mxu1 %v2051_v5 }
  0x55   : > { %786 = vmatpush.bf16.msra.mxu2 %v2057_v11 }
  0x56   : > { %799 = vmatpush.bf16.msra.mxu3 %v2061_v12 }
  0x57   : > { %761 = vmatpush.bf16.msra.mxu0 %v2063_v13 }
  0x58   : > { %774 = vmatpush.bf16.msra.mxu1 %v2066_v17 }
  0x59   : > { %787 = vmatpush.bf16.msra.mxu2 %v2069_v23 }
  0x5a   : > { %800 = vmatpush.bf16.msra.mxu3 %v2073_v24 }
  0x5b   : > { %762 = vmatpush.bf16.msra.mxu0 %v2075_v25 }
  0x5c   : > { %775 = vmatpush.bf16.msra.mxu1 %v2078_v29 }
  0x5d   : > { %788 = vmatpush.bf16.msra.mxu2 %v2082_v36 }
  0x5e   : > { %801 = vmatpush.bf16.msra.mxu3 %v2086_v37  ;;  %1447 = vmatmul.msk.bf16.gmra.mxu0 %vm399_vm0, %v1643_v33 }
  0x5f   : > { %763 = vmatpush.bf16.msra.mxu0 %v2088_v38  ;;  %1451 = vmatmul.msk.bf16.gmra.mxu1 %vm399_vm0, %v1643_v33 }
  0x60   : > { %776 = vmatpush.bf16.msra.mxu1 %v2091_v42  ;;  %1455 = vmatmul.msk.bf16.gmra.mxu2 %vm399_vm0, %v1643_v33 }
  0x61   : > { %789 = vmatpush.bf16.msra.mxu2 %v2094_v48  ;;  %1459 = vmatmul.msk.bf16.gmra.mxu3 %vm399_vm0, %v1643_v33 }
  0x62   : > { %802 = vmatpush.bf16.msra.mxu3 %v2098_v49 }
  0x63   : > { %764 = vmatpush.bf16.msra.mxu0 %v2100_v50 }
  0x64   : > { %777 = vmatpush.bf16.msra.mxu1 %v2104_v54 }
  0x65   : > { %790 = vmatpush.bf16.msra.mxu2 %v2110_v58 }
  0x66   : > { %803 = vmatpush.bf16.msra.mxu3 %v2114_v62 }
  0x67   : > { %765 = vmatpush.bf16.msra.mxu0 %v2116_v2 }
  0x68   : > { %778 = vmatpush.bf16.msra.mxu1 %v2119_v7 }
  0x69   : > { %791 = vmatpush.bf16.msra.mxu2 %v2122_v18 }
  0x6a   : > { %804 = vmatpush.bf16.msra.mxu3 %v2126_v19 }
  0x6b   : > { %766 = vmatpush.bf16.msra.mxu0 %v2128_v20 }
  0x6c   : > { %779 = vmatpush.bf16.msra.mxu1 %v2131_v26 }
  0x6d   : > { %792 = vmatpush.bf16.msra.mxu2 %v2134_v30 }
  0x6e   : > { %805 = vmatpush.bf16.msra.mxu3 %v2138_v31  ;;  %696 = vmatmul.bf16.vlgmr.msrb.gmra.mxu0 %v1923_v34 }
  0x6f   : > { %709 = vmatmul.bf16.vlgmr.msrb.gmra.mxu1 %v1923_v34  ;;  %830 = vmatpush.bf16.msrb.mxu0 %v2038_v53 }
  0x70   : > { %722 = vmatmul.bf16.vlgmr.msrb.gmra.mxu2 %v1923_v34  ;;  %843 = vmatpush.bf16.msrb.mxu1 %v2040_v57 }
  0x71   : > { %735 = vmatmul.bf16.vlgmr.msrb.gmra.mxu3 %v1923_v34  ;;  %856 = vmatpush.bf16.msrb.mxu2 %v2042_v63 }
  0x72   : > { %869 = vmatpush.bf16.msrb.mxu3 %v2045_v0 }
  0x73   : > { %831 = vmatpush.bf16.msrb.mxu0 %v2047_v1 }
  0x74   : > { %844 = vmatpush.bf16.msrb.mxu1 %v2051_v5 }
  0x75   : > { %857 = vmatpush.bf16.msrb.mxu2 %v2057_v11 }
  0x76   : > { %870 = vmatpush.bf16.msrb.mxu3 %v2061_v12 }
  0x77   : > { %832 = vmatpush.bf16.msrb.mxu0 %v2063_v13 }
  0x78   : > { %845 = vmatpush.bf16.msrb.mxu1 %v2066_v17 }
  0x79   : > { %858 = vmatpush.bf16.msrb.mxu2 %v2069_v23 }
  0x7a   : > { %871 = vmatpush.bf16.msrb.mxu3 %v2073_v24 }
  0x7b   : > { %833 = vmatpush.bf16.msrb.mxu0 %v2075_v25 }
  0x7c   : > { %846 = vmatpush.bf16.msrb.mxu1 %v2078_v29 }
  0x7d   : > { %859 = vmatpush.bf16.msrb.mxu2 %v2082_v36 }
  0x7e   : > { %872 = vmatpush.bf16.msrb.mxu3 %v2086_v37 }
  0x7f   : > { %834 = vmatpush.bf16.msrb.mxu0 %v2088_v38 }
  0x80   : > { %847 = vmatpush.bf16.msrb.mxu1 %v2091_v42 }
  0x81   : > { %860 = vmatpush.bf16.msrb.mxu2 %v2094_v48 }
  0x82   : > { %873 = vmatpush.bf16.msrb.mxu3 %v2098_v49 }
  0x83   : > { %835 = vmatpush.bf16.msrb.mxu0 %v2100_v50 }
  0x84   : > { %848 = vmatpush.bf16.msrb.mxu1 %v2104_v54 }
  0x85   : > { %861 = vmatpush.bf16.msrb.mxu2 %v2110_v58 }
  0x86   : > { %874 = vmatpush.bf16.msrb.mxu3 %v2114_v62 }
  0x87   : > { %836 = vmatpush.bf16.msrb.mxu0 %v2116_v2 }
  0x88   : > { %849 = vmatpush.bf16.msrb.mxu1 %v2119_v7 }
  0x89   : > { %862 = vmatpush.bf16.msrb.mxu2 %v2122_v18 }
  0x8a   : > { %875 = vmatpush.bf16.msrb.mxu3 %v2126_v19 }
  0x8b   : > { %837 = vmatpush.bf16.msrb.mxu0 %v2128_v20 }
  0x8c   : > { %850 = vmatpush.bf16.msrb.mxu1 %v2131_v26 }
  0x8d   : > { %863 = vmatpush.bf16.msrb.mxu2 %v2134_v30 }
  0x8e   : > { %876 = vmatpush.bf16.msrb.mxu3 %v2138_v31 }
  0xab   : > { %v421_v35 = vpop.f32.mrf.mxu0 }
  0xac   : > { %v450_v39 = vpop.f32.mrf.mxu1 }
  0xb3   : > { %v2220_v43 = vpop.f32.mrf.mxu2  ;;  %v423_v46 = vpop.f32.mrf.mxu0 }
  0xb4   : > { %v2222_v45 = vpop.f32.mrf.mxu3  ;;  %v2224_v47 = vadd.f32 %v423_v46, %v291_v41  ;;  %v452_v51 = vpop.f32.mrf.mxu1 }
  0xb5   : > { %v2226_v52 = vadd.f32 %v452_v51, %v292_v44 }
  0xbb   : > { %v481_v59 = vpop.f32.mrf.mxu2  ;;  %v426_v3 = vpop.f32.mrf.mxu0 }
  0xbc   : > { %v2233_v60 = vadd.f32 %v481_v59, %v2228_v55  ;;  %v510_v61 = vpop.f32.mrf.mxu3  ;;  %v2238_v6 = vadd.f32 %v426_v3, %v291_v41  ;;  %v455_v8 = vpop.f32.mrf.mxu1 }
  0xbd   : > { %v2236_v4 = vadd.f32 %v510_v61, %v2230_v56  ;;  %v2240_v9 = vadd.f32 %v455_v8, %v292_v44 }
  0xc3   : > { %v484_v10 = vpop.f32.mrf.mxu2  ;;  %v428_v16 = vpop.f32.mrf.mxu0 }
  0xc4   : > { %v2243_v14 = vadd.f32 %v484_v10, %v2228_v55  ;;  %v513_v15 = vpop.f32.mrf.mxu3  ;;  %v2248_v22 = vadd.f32 %v428_v16, %v291_v41  ;;  %v457_v27 = vpop.f32.mrf.mxu1 }
  0xc5   : > { %v2246_v21 = vadd.f32 %v513_v15, %v2230_v56  ;;  %v2250_v28 = vadd.f32 %v457_v27, %v292_v44 }
  0xc7   : > { %2550 = vst [vmem:[#allocation11_spill] sm:$0xff] %v2250_v28 }
  0xcb   : > { %v486_v32 = vpop.f32.mrf.mxu2  ;;  %v431_v40 = vpop.f32.mrf.mxu0 }
  0xcc   : > { %v2253_v33 = vadd.f32 %v486_v32, %v2228_v55  ;;  %v515_v34 = vpop.f32.mrf.mxu3  ;;  %v2258_v51 = vadd.f32 %v431_v40, %v291_v41  ;;  %v460_v59 = vpop.f32.mrf.mxu1 }
  0xcd   : > { %v2256_v46 = vadd.f32 %v515_v34, %v2230_v56  ;;  %v2260_v61 = vadd.f32 %v460_v59, %v292_v44 }
  0xce   : > { %2551 = vst [vmem:[#allocation12_spill] sm:$0xff] %v2253_v33 }
  0xcf   : > { %2552 = vst [vmem:[#allocation13_spill] sm:$0xff] %v2256_v46 }
  0xd0   : > { %2553 = vst [vmem:[#allocation14_spill] sm:$0xff] %v2258_v51 }
  0xd1   : > { %2554 = vst [vmem:[#allocation15_spill] sm:$0xff] %v2260_v61 }
  0xd3   : > { %v489_v3 = vpop.f32.mrf.mxu2  ;;  %v433_v15 = vpop.f32.mrf.mxu0 }
  0xd4   : > { %v2263_v8 = vadd.f32 %v489_v3, %v2228_v55  ;;  %v518_v10 = vpop.f32.mrf.mxu3  ;;  %v2268_v27 = vadd.f32 %v433_v15, %v291_v41  ;;  %v462_v32 = vpop.f32.mrf.mxu1 }
  0xd5   : > { %v2266_v16 = vadd.f32 %v518_v10, %v2230_v56  ;;  %v2270_v33 = vadd.f32 %v462_v32, %v292_v44 }
  0xd6   : > { %2555 = vst [vmem:[#allocation16_spill] sm:$0xff] %v2263_v8 }
  0xd7   : > { %2556 = vst [vmem:[#allocation17_spill] sm:$0xff] %v2266_v16 }
  0xd8   : > { %2557 = vst [vmem:[#allocation18_spill] sm:$0xff] %v2268_v27 }
  0xd9   : > { %2558 = vst [vmem:[#allocation19_spill] sm:$0xff] %v2270_v33 }
  0xdb   : > { %v491_v34 = vpop.f32.mrf.mxu2  ;;  %v436_v61 = vpop.f32.mrf.mxu0 }
  0xdc   : > { %v2273_v40 = vadd.f32 %v491_v34, %v2228_v55  ;;  %v520_v59 = vpop.f32.mrf.mxu3  ;;  %v2278_v3 = vadd.f32 %v436_v61, %v291_v41  ;;  %v465_v8 = vpop.f32.mrf.mxu1 }
  0xdd   : > { %v2276_v51 = vadd.f32 %v520_v59, %v2230_v56  ;;  %v2280_v46 = vadd.f32 %v465_v8, %v292_v44  ;;  %v422_v59 = vadd.f32 %v421_v35, %v291_v41  ;;  %v509_v35 = vadd.f32 %v2222_v45, %v2230_v56 }
  0xde   : > { %2559 = vst [vmem:[#allocation20_spill] sm:$0xff] %v2273_v40 }
  0xdf   : > { %2560 = vst [vmem:[#allocation21_spill] sm:$0xff] %v2276_v51 }
  0xe0   : > { %2561 = vst [vmem:[#allocation22_spill] sm:$0xff] %v2278_v3  ;;  %v451_v3 = vadd.f32 %v450_v39, %v292_v44 }
  0xe1   : > { %2562 = vst [vmem:[#allocation23_spill] sm:$0xff] %v2280_v46 }
  0xe3   : > { %v494_v10 = vpop.f32.mrf.mxu2  ;;  %v438_v33 = vpop.f32.mrf.mxu0 }
  0xe4   : > { %v2283_v15 = vadd.f32 %v494_v10, %v2228_v55  ;;  %v523_v32 = vpop.f32.mrf.mxu3  ;;  %v2288_v34 = vadd.f32 %v438_v33, %v291_v41  ;;  %v467_v40 = vpop.f32.mrf.mxu1 }
  0xe5   : > { %v2286_v27 = vadd.f32 %v523_v32, %v2230_v56  ;;  %v2290_v16 = vadd.f32 %v467_v40, %v292_v44  ;;  %v480_v40 = vadd.f32 %v2220_v43, %v2228_v55 }
  0xe6   : > { %2563 = vst [vmem:[#allocation24_spill] sm:$0xff] %v2283_v15 }
  0xe7   : > { %2564 = vst [vmem:[#allocation25_spill] sm:$0xff] %v2286_v27 }
  0xeb   : > { %v496_v61 = vpop.f32.mrf.mxu2  ;;  %v697_v51 = vpop.f32.mrf.mxu0 }
  0xec   : > { %v2293_v8 = vadd.f32 %v496_v61, %v2228_v55  ;;  %v525_v46 = vpop.f32.mrf.mxu3  ;;  %v698_v15 = vadd.f32 %v697_v51, %v422_v59  ;;  %v710_v28 = vpop.f32.mrf.mxu1 }
  0xed   : > { %v2296_v10 = vadd.f32 %v525_v46, %v2230_v56  ;;  %v711_v32 = vadd.f32 %v710_v28, %v451_v3 }
  0xee   : > { %2565 = vst [vmem:[#allocation26_spill] sm:$0xff] %v2293_v8  ;;  %v740_v27 = vmul.f32 0.5, %v698_v15 }
  0xef   : > { %2566 = vst [vmem:[#allocation27_spill] sm:$0xff] %v2296_v10  ;;  %v744_v33 = vmul.f32 0.5, %v711_v32 }
  0xf0   : > { %1707 = vtanh.f32 %v740_v27 }
  0xf1   : > { %1709 = vtanh.f32 %v744_v33 }
  0xf3   : > { %v723_v39 = vpop.f32.mrf.mxu2  ;;  %v699_v61 = vpop.f32.mrf.mxu0 }
  0xf4   : > { %v724_v41 = vadd.f32 %v723_v39, %v480_v40  ;;  %v736_v44 = vpop.f32.mrf.mxu3  ;;  %v712_v46 = vpop.f32.mrf.mxu1 }
  0xf5   : > { %v737_v8 = vadd.f32 %v736_v44, %v509_v35 }
  0xf6   : > { %1711 = vtanh.f32 %v724_v41  ;;  %v1708_v51 = vpop.eup %1707 }
  0xf7   : > { %v749_v59 = vmul.f32 0.5, %v737_v8  ;;  %v1710_v28 = vpop.eup %1709  ;;  %v742_v3 = vmul.f32 0.5, %v1708_v51 }
  0xf8   : > { %v746_v15 = vmul.f32 0.5, %v1710_v28 }
  0xf9   : > { %1713 = vtanh.f32 %v749_v59  ;;  %v743_v27 = vadd.f32 0.5, %v742_v3 }
  0xfa   : > { %v747_v32 = vadd.f32 0.5, %v746_v15 }
  0xfb   : > { %v725_v43 = vpop.f32.mrf.mxu2 }
  0xfc   : > { %v1712_v55 = vpop.eup %1711  ;;  %v738_v33 = vpop.f32.mrf.mxu3  ;;  %v753_v10 = vmul.f32 0.0, %v747_v32 }
  0xfd   : > { %v754_v45 = vmul.f32 %v1712_v55, %v743_v27 }
  0xff   : > { %v1714_v56 = vpop.eup %1713  ;;  %v2302_v40 = vadd.f32 %v754_v45, %v753_v10 }
 0x100   : > { %v751_v35 = vmul.f32 0.5, %v1714_v56 }
 0x101   : > { %1715 = vtanh.f32 %v2302_v40 }
 0x102   : > { %v752_v39 = vadd.f32 0.5, %v751_v35 }
 0x107   : > { %v1716_v41 = vpop.eup %1715 }
 0x108   : > { %v757_v8 = vmul.f32 %v1716_v41, %v752_v39 }
 0x10a   : > { %v758_v44 = vpack.c.bf16 %v757_v8, %v757_v8 }
 0x10c   : > { %767 = vmatmul.bf16.vlgmr.msra.gmra.mxu0 %v758_v44  ;;  %780 = vmatmul.bf16.vlgmr.msra.gmra.mxu1 %v758_v44 }
 0x10d   : > { %793 = vmatmul.bf16.vlgmr.msra.gmra.mxu2 %v758_v44  ;;  %806 = vmatmul.bf16.vlgmr.msra.gmra.mxu3 %v758_v44 }
 0x10e   : > { %901 = vmatpush.bf16.msra.mxu0 %v2038_v53  ;;  %914 = vmatpush.bf16.msra.mxu1 %v2040_v57 }
 0x10f   : > { %927 = vmatpush.bf16.msra.mxu2 %v2042_v63  ;;  %940 = vmatpush.bf16.msra.mxu3 %v2045_v0 }
 0x112   : > { %902 = vmatpush.bf16.msra.mxu0 %v2047_v1  ;;  %915 = vmatpush.bf16.msra.mxu1 %v2051_v5 }
 0x113   : > { %928 = vmatpush.bf16.msra.mxu2 %v2057_v11  ;;  %941 = vmatpush.bf16.msra.mxu3 %v2061_v12 }
 0x116   : > { %903 = vmatpush.bf16.msra.mxu0 %v2063_v13  ;;  %916 = vmatpush.bf16.msra.mxu1 %v2066_v17 }
 0x117   : > { %929 = vmatpush.bf16.msra.mxu2 %v2069_v23  ;;  %942 = vmatpush.bf16.msra.mxu3 %v2073_v24 }
 0x11a   : > { %904 = vmatpush.bf16.msra.mxu0 %v2075_v25  ;;  %917 = vmatpush.bf16.msra.mxu1 %v2078_v29 }
 0x11b   : > { %930 = vmatpush.bf16.msra.mxu2 %v2082_v36  ;;  %943 = vmatpush.bf16.msra.mxu3 %v2086_v37 }
 0x11e   : > { %905 = vmatpush.bf16.msra.mxu0 %v2088_v38  ;;  %918 = vmatpush.bf16.msra.mxu1 %v2091_v42 }
 0x11f   : > { %931 = vmatpush.bf16.msra.mxu2 %v2094_v48  ;;  %944 = vmatpush.bf16.msra.mxu3 %v2098_v49 }
 0x122   : > { %906 = vmatpush.bf16.msra.mxu0 %v2100_v50  ;;  %919 = vmatpush.bf16.msra.mxu1 %v2104_v54 }
 0x123   : > { %932 = vmatpush.bf16.msra.mxu2 %v2110_v58  ;;  %945 = vmatpush.bf16.msra.mxu3 %v2114_v62 }
 0x126   : > { %907 = vmatpush.bf16.msra.mxu0 %v2116_v2  ;;  %920 = vmatpush.bf16.msra.mxu1 %v2119_v7 }
 0x127   : > { %933 = vmatpush.bf16.msra.mxu2 %v2122_v18  ;;  %946 = vmatpush.bf16.msra.mxu3 %v2126_v19 }
 0x12a   : > { %908 = vmatpush.bf16.msra.mxu0 %v2128_v20  ;;  %921 = vmatpush.bf16.msra.mxu1 %v2131_v26 }
 0x12b   : > { %934 = vmatpush.bf16.msra.mxu2 %v2134_v30  ;;  %947 = vmatpush.bf16.msra.mxu3 %v2138_v31 }
 0x189   : > { %v768_v10 = vpop.f32.mrf.mxu0  ;;  %v781_v61 = vpop.f32.mrf.mxu1 }
 0x18a   : > { %v769_v46 = vadd.f32 %v768_v10, %v2224_v47  ;;  %v782_v51 = vadd.f32 %v781_v61, %v2226_v52 }
 0x18c   : > { %v811_v59 = vmul.f32 0.5, %v769_v46  ;;  %v815_v28 = vmul.f32 0.5, %v782_v51 }
 0x18e   : > { %1717 = vtanh.f32 %v811_v59 }
 0x18f   : > { %1719 = vtanh.f32 %v815_v28 }
 0x190   : > { %v794_v3 = vpop.f32.mrf.mxu2  ;;  %v807_v15 = vpop.f32.mrf.mxu3 }
 0x191   : > { %v795_v27 = vadd.f32 %v794_v3, %v2233_v60  ;;  %v808_v32 = vadd.f32 %v807_v15, %v2236_v4  ;;  %v770_v43 = vpop.f32.mrf.mxu0  ;;  %v783_v55 = vpop.f32.mrf.mxu1 }
 0x193   : > { %1721 = vtanh.f32 %v795_v27  ;;  %v820_v33 = vmul.f32 0.5, %v808_v32 }
 0x194   : > { %v1718_v45 = vpop.eup %1717 }
 0x195   : > { %v1720_v56 = vpop.eup %1719  ;;  %v813_v35 = vmul.f32 0.5, %v1718_v45  ;;  %1723 = vtanh.f32 %v820_v33 }
 0x196   : > { %v817_v47 = vmul.f32 0.5, %v1720_v56 }
 0x197   : > { %v814_v52 = vadd.f32 0.5, %v813_v35 }
 0x198   : > { %v818_v39 = vadd.f32 0.5, %v817_v47  ;;  %v796_v41 = vpop.f32.mrf.mxu2  ;;  %v809_v8 = vpop.f32.mrf.mxu3 }
 0x199   : > { %v1722_v44 = vpop.eup %1721 }
 0x19a   : > { %v824_v10 = vmul.f32 %v818_v39, %v2302_v40  ;;  %v825_v61 = vmul.f32 %v1722_v44, %v814_v52 }
 0x19b   : > { %v1724_v60 = vpop.eup %1723 }
 0x19c   : > { %v2342_v46 = vadd.f32 %v825_v61, %v824_v10  ;;  %v822_v4 = vmul.f32 0.5, %v1724_v60 }
 0x19e   : > { %1725 = vtanh.f32 %v2342_v46  ;;  %v823_v51 = vadd.f32 0.5, %v822_v4 }
 0x1a4   : > { %v1726_v59 = vpop.eup %1725 }
 0x1a5   : > { %v828_v28 = vmul.f32 %v1726_v59, %v823_v51 }
 0x1a7   : > { %v829_v3 = vpack.c.bf16 %v828_v28, %v828_v28 }
 0x1a9   : > { %838 = vmatmul.bf16.vlgmr.msrb.gmra.mxu0 %v829_v3  ;;  %851 = vmatmul.bf16.vlgmr.msrb.gmra.mxu1 %v829_v3 }
 0x1aa   : > { %864 = vmatmul.bf16.vlgmr.msrb.gmra.mxu2 %v829_v3  ;;  %877 = vmatmul.bf16.vlgmr.msrb.gmra.mxu3 %v829_v3 }
 0x1ab   : > { %972 = vmatpush.bf16.msrb.mxu0 %v2038_v53  ;;  %985 = vmatpush.bf16.msrb.mxu1 %v2040_v57 }
 0x1ac   : > { %998 = vmatpush.bf16.msrb.mxu2 %v2042_v63  ;;  %1011 = vmatpush.bf16.msrb.mxu3 %v2045_v0 }
 0x1af   : > { %973 = vmatpush.bf16.msrb.mxu0 %v2047_v1  ;;  %986 = vmatpush.bf16.msrb.mxu1 %v2051_v5 }
 0x1b0   : > { %999 = vmatpush.bf16.msrb.mxu2 %v2057_v11  ;;  %1012 = vmatpush.bf16.msrb.mxu3 %v2061_v12 }
 0x1b3   : > { %974 = vmatpush.bf16.msrb.mxu0 %v2063_v13  ;;  %987 = vmatpush.bf16.msrb.mxu1 %v2066_v17 }
 0x1b4   : > { %1000 = vmatpush.bf16.msrb.mxu2 %v2069_v23  ;;  %1013 = vmatpush.bf16.msrb.mxu3 %v2073_v24 }
 0x1b7   : > { %975 = vmatpush.bf16.msrb.mxu0 %v2075_v25  ;;  %988 = vmatpush.bf16.msrb.mxu1 %v2078_v29 }
 0x1b8   : > { %1001 = vmatpush.bf16.msrb.mxu2 %v2082_v36  ;;  %1014 = vmatpush.bf16.msrb.mxu3 %v2086_v37 }
 0x1bb   : > { %976 = vmatpush.bf16.msrb.mxu0 %v2088_v38  ;;  %989 = vmatpush.bf16.msrb.mxu1 %v2091_v42 }
 0x1bc   : > { %1002 = vmatpush.bf16.msrb.mxu2 %v2094_v48  ;;  %1015 = vmatpush.bf16.msrb.mxu3 %v2098_v49 }
 0x1bf   : > { %977 = vmatpush.bf16.msrb.mxu0 %v2100_v50  ;;  %990 = vmatpush.bf16.msrb.mxu1 %v2104_v54 }
 0x1c0   : > { %1003 = vmatpush.bf16.msrb.mxu2 %v2110_v58  ;;  %1016 = vmatpush.bf16.msrb.mxu3 %v2114_v62 }
 0x1c3   : > { %978 = vmatpush.bf16.msrb.mxu0 %v2116_v2  ;;  %991 = vmatpush.bf16.msrb.mxu1 %v2119_v7 }
 0x1c4   : > { %1004 = vmatpush.bf16.msrb.mxu2 %v2122_v18  ;;  %1017 = vmatpush.bf16.msrb.mxu3 %v2126_v19 }
 0x1c7   : > { %979 = vmatpush.bf16.msrb.mxu0 %v2128_v20  ;;  %992 = vmatpush.bf16.msrb.mxu1 %v2131_v26 }
 0x1c8   : > { %1005 = vmatpush.bf16.msrb.mxu2 %v2134_v30  ;;  %1018 = vmatpush.bf16.msrb.mxu3 %v2138_v31 }
 0x226   : > { %v839_v40 = vpop.f32.mrf.mxu0  ;;  %v852_v15 = vpop.f32.mrf.mxu1 }
 0x227   : > { %v840_v27 = vadd.f32 %v839_v40, %v2238_v6  ;;  %v853_v32 = vadd.f32 %v852_v15, %v2240_v9 }
 0x229   : > { %v882_v43 = vmul.f32 0.5, %v840_v27  ;;  %v886_v55 = vmul.f32 0.5, %v853_v32 }
 0x22b   : > { %1727 = vtanh.f32 %v882_v43 }
 0x22c   : > { %1729 = vtanh.f32 %v886_v55  ;;  %v2567_v55 = vld [vmem:[#allocation11_spill] sm:$0xff] }
 0x22d   : > { %v865_v33 = vpop.f32.mrf.mxu2  ;;  %v878_v45 = vpop.f32.mrf.mxu3 }
 0x22e   : > { %v866_v56 = vadd.f32 %v865_v33, %v2243_v14  ;;  %v879_v35 = vadd.f32 %v878_v45, %v2246_v21  ;;  %v841_v47 = vpop.f32.mrf.mxu0  ;;  %v854_v52 = vpop.f32.mrf.mxu1 }
 0x22f   : > { %v2568_v52 = vld [vmem:[#allocation12_spill] sm:$0xff] }
 0x230   : > { %1731 = vtanh.f32 %v866_v56  ;;  %v891_v39 = vmul.f32 0.5, %v879_v35 }
 0x231   : > { %v1728_v41 = vpop.eup %1727 }
 0x232   : > { %v1730_v8 = vpop.eup %1729  ;;  %v884_v44 = vmul.f32 0.5, %v1728_v41  ;;  %1733 = vtanh.f32 %v891_v39  ;;  %v2569_v41 = vld [vmem:[#allocation13_spill] sm:$0xff] }
 0x233   : > { %v888_v6 = vmul.f32 0.5, %v1730_v8 }
 0x234   : > { %v885_v9 = vadd.f32 0.5, %v884_v44 }
 0x235   : > { %v889_v10 = vadd.f32 0.5, %v888_v6  ;;  %v867_v61 = vpop.f32.mrf.mxu2  ;;  %v880_v60 = vpop.f32.mrf.mxu3 }
 0x236   : > { %v1732_v4 = vpop.eup %1731 }
 0x237   : > { %v895_v51 = vmul.f32 %v889_v10, %v2342_v46  ;;  %v896_v59 = vmul.f32 %v1732_v4, %v885_v9 }
 0x238   : > { %v1734_v14 = vpop.eup %1733 }
 0x239   : > { %v2382_v28 = vadd.f32 %v896_v59, %v895_v51  ;;  %v893_v21 = vmul.f32 0.5, %v1734_v14 }
 0x23b   : > { %1735 = vtanh.f32 %v2382_v28  ;;  %v894_v3 = vadd.f32 0.5, %v893_v21 }
 0x241   : > { %v1736_v40 = vpop.eup %1735 }
 0x242   : > { %v899_v15 = vmul.f32 %v1736_v40, %v894_v3 }
 0x244   : > { %v900_v27 = vpack.c.bf16 %v899_v15, %v899_v15 }
 0x246   : > { %909 = vmatmul.bf16.vlgmr.msra.gmra.mxu0 %v900_v27  ;;  %922 = vmatmul.bf16.vlgmr.msra.gmra.mxu1 %v900_v27 }
 0x247   : > { %935 = vmatmul.bf16.vlgmr.msra.gmra.mxu2 %v900_v27  ;;  %948 = vmatmul.bf16.vlgmr.msra.gmra.mxu3 %v900_v27 }
 0x248   : > { %1043 = vmatpush.bf16.msra.mxu0 %v2038_v53  ;;  %1056 = vmatpush.bf16.msra.mxu1 %v2040_v57 }
 0x249   : > { %1069 = vmatpush.bf16.msra.mxu2 %v2042_v63  ;;  %1082 = vmatpush.bf16.msra.mxu3 %v2045_v0 }
 0x24c   : > { %1044 = vmatpush.bf16.msra.mxu0 %v2047_v1  ;;  %1057 = vmatpush.bf16.msra.mxu1 %v2051_v5 }
 0x24d   : > { %1070 = vmatpush.bf16.msra.mxu2 %v2057_v11  ;;  %1083 = vmatpush.bf16.msra.mxu3 %v2061_v12 }
 0x250   : > { %1045 = vmatpush.bf16.msra.mxu0 %v2063_v13  ;;  %1058 = vmatpush.bf16.msra.mxu1 %v2066_v17 }
 0x251   : > { %1071 = vmatpush.bf16.msra.mxu2 %v2069_v23  ;;  %1084 = vmatpush.bf16.msra.mxu3 %v2073_v24 }
 0x254   : > { %1046 = vmatpush.bf16.msra.mxu0 %v2075_v25  ;;  %1059 = vmatpush.bf16.msra.mxu1 %v2078_v29 }
 0x255   : > { %1072 = vmatpush.bf16.msra.mxu2 %v2082_v36  ;;  %1085 = vmatpush.bf16.msra.mxu3 %v2086_v37 }
 0x258   : > { %1047 = vmatpush.bf16.msra.mxu0 %v2088_v38  ;;  %1060 = vmatpush.bf16.msra.mxu1 %v2091_v42 }
 0x259   : > { %1073 = vmatpush.bf16.msra.mxu2 %v2094_v48  ;;  %1086 = vmatpush.bf16.msra.mxu3 %v2098_v49 }
 0x25c   : > { %1048 = vmatpush.bf16.msra.mxu0 %v2100_v50  ;;  %1061 = vmatpush.bf16.msra.mxu1 %v2104_v54 }
 0x25d   : > { %1074 = vmatpush.bf16.msra.mxu2 %v2110_v58  ;;  %1087 = vmatpush.bf16.msra.mxu3 %v2114_v62 }
 0x260   : > { %1049 = vmatpush.bf16.msra.mxu0 %v2116_v2  ;;  %1062 = vmatpush.bf16.msra.mxu1 %v2119_v7 }
 0x261   : > { %1075 = vmatpush.bf16.msra.mxu2 %v2122_v18  ;;  %1088 = vmatpush.bf16.msra.mxu3 %v2126_v19 }
 0x264   : > { %1050 = vmatpush.bf16.msra.mxu0 %v2128_v20  ;;  %1063 = vmatpush.bf16.msra.mxu1 %v2131_v26 }
 0x265   : > { %1076 = vmatpush.bf16.msra.mxu2 %v2134_v30  ;;  %1089 = vmatpush.bf16.msra.mxu3 %v2138_v31 }
 0x2c3   : > { %v910_v46 = vpop.f32.mrf.mxu0  ;;  %v923_v32 = vpop.f32.mrf.mxu1 }
 0x2c4   : > { %v911_v43 = vadd.f32 %v910_v46, %v2248_v22  ;;  %v924_v33 = vadd.f32 %v923_v32, %v2567_v55 }
 0x2c6   : > { %v953_v45 = vmul.f32 0.5, %v911_v43  ;;  %v957_v56 = vmul.f32 0.5, %v924_v33 }
 0x2c8   : > { %1737 = vtanh.f32 %v953_v45 }
 0x2c9   : > { %1739 = vtanh.f32 %v957_v56  ;;  %v2570_v56 = vld [vmem:[#allocation14_spill] sm:$0xff] }
 0x2ca   : > { %v936_v35 = vpop.f32.mrf.mxu2  ;;  %v949_v47 = vpop.f32.mrf.mxu3 }
 0x2cb   : > { %v937_v39 = vadd.f32 %v936_v35, %v2568_v52  ;;  %v950_v8 = vadd.f32 %v949_v47, %v2569_v41  ;;  %v912_v44 = vpop.f32.mrf.mxu0  ;;  %v925_v6 = vpop.f32.mrf.mxu1  ;;  %v2571_v47 = vld [vmem:[#allocation15_spill] sm:$0xff] }
 0x2cc   : > { %v2572_v6 = vld [vmem:[#allocation16_spill] sm:$0xff] }
 0x2cd   : > { %1741 = vtanh.f32 %v937_v39  ;;  %v962_v9 = vmul.f32 0.5, %v950_v8 }
 0x2ce   : > { %v1738_v10 = vpop.eup %1737 }
 0x2cf   : > { %v1740_v61 = vpop.eup %1739  ;;  %v955_v60 = vmul.f32 0.5, %v1738_v10  ;;  %1743 = vtanh.f32 %v962_v9  ;;  %v2573_v10 = vld [vmem:[#allocation17_spill] sm:$0xff] }
 0x2d0   : > { %v959_v22 = vmul.f32 0.5, %v1740_v61 }
 0x2d1   : > { %v956_v4 = vadd.f32 0.5, %v955_v60 }
 0x2d2   : > { %v960_v51 = vadd.f32 0.5, %v959_v22  ;;  %v938_v59 = vpop.f32.mrf.mxu2  ;;  %v951_v14 = vpop.f32.mrf.mxu3 }
 0x2d3   : > { %v1742_v21 = vpop.eup %1741 }
 0x2d4   : > { %v966_v3 = vmul.f32 %v960_v51, %v2382_v28  ;;  %v967_v40 = vmul.f32 %v1742_v21, %v956_v4 }
 0x2d5   : > { %v1744_v15 = vpop.eup %1743 }
 0x2d6   : > { %v2422_v27 = vadd.f32 %v967_v40, %v966_v3  ;;  %v964_v46 = vmul.f32 0.5, %v1744_v15 }
 0x2d8   : > { %1745 = vtanh.f32 %v2422_v27  ;;  %v965_v32 = vadd.f32 0.5, %v964_v46 }
 0x2de   : > { %v1746_v43 = vpop.eup %1745 }
 0x2df   : > { %v970_v55 = vmul.f32 %v1746_v43, %v965_v32 }
 0x2e1   : > { %v971_v33 = vpack.c.bf16 %v970_v55, %v970_v55 }
 0x2e3   : > { %980 = vmatmul.bf16.vlgmr.msrb.gmra.mxu0 %v971_v33  ;;  %993 = vmatmul.bf16.vlgmr.msrb.gmra.mxu1 %v971_v33 }
 0x2e4   : > { %1006 = vmatmul.bf16.vlgmr.msrb.gmra.mxu2 %v971_v33  ;;  %1019 = vmatmul.bf16.vlgmr.msrb.gmra.mxu3 %v971_v33 }
 0x2e5   : > { %1114 = vmatpush.bf16.msrb.mxu0 %v2038_v53  ;;  %1127 = vmatpush.bf16.msrb.mxu1 %v2040_v57 }
 0x2e6   : > { %1140 = vmatpush.bf16.msrb.mxu2 %v2042_v63  ;;  %1153 = vmatpush.bf16.msrb.mxu3 %v2045_v0 }
 0x2e9   : > { %1115 = vmatpush.bf16.msrb.mxu0 %v2047_v1  ;;  %1128 = vmatpush.bf16.msrb.mxu1 %v2051_v5 }
 0x2ea   : > { %1141 = vmatpush.bf16.msrb.mxu2 %v2057_v11  ;;  %1154 = vmatpush.bf16.msrb.mxu3 %v2061_v12 }
 0x2ed   : > { %1116 = vmatpush.bf16.msrb.mxu0 %v2063_v13  ;;  %1129 = vmatpush.bf16.msrb.mxu1 %v2066_v17 }
 0x2ee   : > { %1142 = vmatpush.bf16.msrb.mxu2 %v2069_v23  ;;  %1155 = vmatpush.bf16.msrb.mxu3 %v2073_v24 }
 0x2f1   : > { %1117 = vmatpush.bf16.msrb.mxu0 %v2075_v25  ;;  %1130 = vmatpush.bf16.msrb.mxu1 %v2078_v29 }
 0x2f2   : > { %1143 = vmatpush.bf16.msrb.mxu2 %v2082_v36  ;;  %1156 = vmatpush.bf16.msrb.mxu3 %v2086_v37 }
 0x2f5   : > { %1118 = vmatpush.bf16.msrb.mxu0 %v2088_v38  ;;  %1131 = vmatpush.bf16.msrb.mxu1 %v2091_v42 }
 0x2f6   : > { %1144 = vmatpush.bf16.msrb.mxu2 %v2094_v48  ;;  %1157 = vmatpush.bf16.msrb.mxu3 %v2098_v49 }
 0x2f9   : > { %1119 = vmatpush.bf16.msrb.mxu0 %v2100_v50  ;;  %1132 = vmatpush.bf16.msrb.mxu1 %v2104_v54 }
 0x2fa   : > { %1145 = vmatpush.bf16.msrb.mxu2 %v2110_v58  ;;  %1158 = vmatpush.bf16.msrb.mxu3 %v2114_v62 }
 0x2fd   : > { %1120 = vmatpush.bf16.msrb.mxu0 %v2116_v2  ;;  %1133 = vmatpush.bf16.msrb.mxu1 %v2119_v7 }
 0x2fe   : > { %1146 = vmatpush.bf16.msrb.mxu2 %v2122_v18  ;;  %1159 = vmatpush.bf16.msrb.mxu3 %v2126_v19 }
 0x301   : > { %1121 = vmatpush.bf16.msrb.mxu0 %v2128_v20  ;;  %1134 = vmatpush.bf16.msrb.mxu1 %v2131_v26 }
 0x302   : > { %1147 = vmatpush.bf16.msrb.mxu2 %v2134_v30  ;;  %1160 = vmatpush.bf16.msrb.mxu3 %v2138_v31 }
 0x360   : > { %v981_v28 = vpop.f32.mrf.mxu0  ;;  %v994_v45 = vpop.f32.mrf.mxu1 }
 0x361   : > { %v982_v35 = vadd.f32 %v981_v28, %v2570_v56  ;;  %v995_v52 = vadd.f32 %v994_v45, %v2571_v47 }
 0x363   : > { %v1024_v39 = vmul.f32 0.5, %v982_v35  ;;  %v1028_v41 = vmul.f32 0.5, %v995_v52 }
 0x365   : > { %1747 = vtanh.f32 %v1024_v39 }
 0x366   : > { %1749 = vtanh.f32 %v1028_v41 }
 0x367   : > { %v1007_v8 = vpop.f32.mrf.mxu2  ;;  %v1020_v44 = vpop.f32.mrf.mxu3 }
 0x368   : > { %v1008_v9 = vadd.f32 %v1007_v8, %v2572_v6  ;;  %v1021_v61 = vadd.f32 %v1020_v44, %v2573_v10  ;;  %v983_v60 = vpop.f32.mrf.mxu0  ;;  %v996_v22 = vpop.f32.mrf.mxu1  ;;  %v2578_v6 = vld [vmem:[#allocation22_spill] sm:$0xff]  ;;  %v2579_v10 = vld [vmem:[#allocation23_spill] sm:$0xff] }
 0x36a   : > { %1751 = vtanh.f32 %v1008_v9  ;;  %v1033_v4 = vmul.f32 0.5, %v1021_v61 }
 0x36b   : > { %v1748_v51 = vpop.eup %1747 }
 0x36c   : > { %v1750_v59 = vpop.eup %1749  ;;  %v1026_v14 = vmul.f32 0.5, %v1748_v51  ;;  %1753 = vtanh.f32 %v1033_v4 }
 0x36d   : > { %v1030_v21 = vmul.f32 0.5, %v1750_v59  ;;  %v2580_v59 = vld [vmem:[#allocation24_spill] sm:$0xff] }
 0x36e   : > { %v1027_v3 = vadd.f32 0.5, %v1026_v14 }
 0x36f   : > { %v1031_v40 = vadd.f32 0.5, %v1030_v21  ;;  %v1009_v15 = vpop.f32.mrf.mxu2  ;;  %v1022_v46 = vpop.f32.mrf.mxu3  ;;  %v2581_v21 = vld [vmem:[#allocation25_spill] sm:$0xff] }
 0x370   : > { %v1752_v32 = vpop.eup %1751 }
 0x371   : > { %v1037_v43 = vmul.f32 %v1031_v40, %v2422_v27  ;;  %v1038_v55 = vmul.f32 %v1752_v32, %v1027_v3 }
 0x372   : > { %v1754_v33 = vpop.eup %1753 }
 0x373   : > { %v2462_v28 = vadd.f32 %v1038_v55, %v1037_v43  ;;  %v1035_v45 = vmul.f32 0.5, %v1754_v33 }
 0x375   : > { %1755 = vtanh.f32 %v2462_v28  ;;  %v1036_v56 = vadd.f32 0.5, %v1035_v45 }
 0x37b   : > { %v1756_v35 = vpop.eup %1755 }
 0x37c   : > { %v1041_v47 = vmul.f32 %v1756_v35, %v1036_v56 }
 0x37e   : > { %v1042_v52 = vpack.c.bf16 %v1041_v47, %v1041_v47 }
 0x380   : > { %1051 = vmatmul.bf16.vlgmr.msra.gmra.mxu0 %v1042_v52  ;;  %1064 = vmatmul.bf16.vlgmr.msra.gmra.mxu1 %v1042_v52 }
 0x381   : > { %1077 = vmatmul.bf16.vlgmr.msra.gmra.mxu2 %v1042_v52  ;;  %1090 = vmatmul.bf16.vlgmr.msra.gmra.mxu3 %v1042_v52 }
 0x382   : > { %1185 = vmatpush.bf16.msra.mxu0 %v2038_v53  ;;  %1198 = vmatpush.bf16.msra.mxu1 %v2040_v57 }
 0x383   : > { %1211 = vmatpush.bf16.msra.mxu2 %v2042_v63  ;;  %1224 = vmatpush.bf16.msra.mxu3 %v2045_v0  ;;  %v2574_v63 = vld [vmem:[#allocation18_spill] sm:$0xff] }
 0x386   : > { %1186 = vmatpush.bf16.msra.mxu0 %v2047_v1  ;;  %1199 = vmatpush.bf16.msra.mxu1 %v2051_v5  ;;  %v2575_v1 = vld [vmem:[#allocation19_spill] sm:$0xff] }
 0x387   : > { %1212 = vmatpush.bf16.msra.mxu2 %v2057_v11  ;;  %1225 = vmatpush.bf16.msra.mxu3 %v2061_v12 }
 0x38a   : > { %1187 = vmatpush.bf16.msra.mxu0 %v2063_v13  ;;  %1200 = vmatpush.bf16.msra.mxu1 %v2066_v17 }
 0x38b   : > { %1213 = vmatpush.bf16.msra.mxu2 %v2069_v23  ;;  %1226 = vmatpush.bf16.msra.mxu3 %v2073_v24  ;;  %v2576_v23 = vld [vmem:[#allocation20_spill] sm:$0xff] }
 0x38e   : > { %1188 = vmatpush.bf16.msra.mxu0 %v2075_v25  ;;  %1201 = vmatpush.bf16.msra.mxu1 %v2078_v29  ;;  %v2577_v25 = vld [vmem:[#allocation21_spill] sm:$0xff] }
 0x38f   : > { %1214 = vmatpush.bf16.msra.mxu2 %v2082_v36  ;;  %1227 = vmatpush.bf16.msra.mxu3 %v2086_v37 }
 0x392   : > { %1189 = vmatpush.bf16.msra.mxu0 %v2088_v38  ;;  %1202 = vmatpush.bf16.msra.mxu1 %v2091_v42 }
 0x393   : > { %1215 = vmatpush.bf16.msra.mxu2 %v2094_v48  ;;  %1228 = vmatpush.bf16.msra.mxu3 %v2098_v49 }
 0x396   : > { %1190 = vmatpush.bf16.msra.mxu0 %v2100_v50  ;;  %1203 = vmatpush.bf16.msra.mxu1 %v2104_v54 }
 0x397   : > { %1216 = vmatpush.bf16.msra.mxu2 %v2110_v58  ;;  %1229 = vmatpush.bf16.msra.mxu3 %v2114_v62 }
 0x39a   : > { %1191 = vmatpush.bf16.msra.mxu0 %v2116_v2  ;;  %1204 = vmatpush.bf16.msra.mxu1 %v2119_v7 }
 0x39b   : > { %1217 = vmatpush.bf16.msra.mxu2 %v2122_v18  ;;  %1230 = vmatpush.bf16.msra.mxu3 %v2126_v19 }
 0x39e   : > { %1192 = vmatpush.bf16.msra.mxu0 %v2128_v20  ;;  %1205 = vmatpush.bf16.msra.mxu1 %v2131_v26 }
 0x39f   : > { %1218 = vmatpush.bf16.msra.mxu2 %v2134_v30  ;;  %1231 = vmatpush.bf16.msra.mxu3 %v2138_v31 }
 0x3fd   : > { %v1052_v53 = vpop.f32.mrf.mxu0  ;;  %v1065_v57 = vpop.f32.mrf.mxu1 }
 0x3fe   : > { %v1053_v0 = vadd.f32 %v1052_v53, %v2574_v63  ;;  %v1066_v5 = vadd.f32 %v1065_v57, %v2575_v1 }
 0x400   : > { %v1095_v11 = vmul.f32 0.5, %v1053_v0  ;;  %v1099_v12 = vmul.f32 0.5, %v1066_v5 }
 0x402   : > { %1757 = vtanh.f32 %v1095_v11 }
 0x403   : > { %1759 = vtanh.f32 %v1099_v12 }
 0x404   : > { %v1078_v13 = vpop.f32.mrf.mxu2  ;;  %v1091_v17 = vpop.f32.mrf.mxu3 }
 0x405   : > { %v1079_v24 = vadd.f32 %v1078_v13, %v2576_v23  ;;  %v1092_v29 = vadd.f32 %v1091_v17, %v2577_v25  ;;  %v1054_v36 = vpop.f32.mrf.mxu0  ;;  %v1067_v37 = vpop.f32.mrf.mxu1 }
 0x407   : > { %1761 = vtanh.f32 %v1079_v24  ;;  %v1104_v38 = vmul.f32 0.5, %v1092_v29 }
 0x408   : > { %v1758_v42 = vpop.eup %1757 }
 0x409   : > { %v1760_v48 = vpop.eup %1759  ;;  %v1097_v49 = vmul.f32 0.5, %v1758_v42  ;;  %1763 = vtanh.f32 %v1104_v38  ;;  %v2582_v38 = vld [vmem:[#allocation26_spill] sm:$0xff] }
 0x40a   : > { %v1101_v50 = vmul.f32 0.5, %v1760_v48  ;;  %v2583_v48 = vld [vmem:[#allocation27_spill] sm:$0xff] }
 0x40b   : > { %v1098_v54 = vadd.f32 0.5, %v1097_v49 }
 0x40c   : > { %v1102_v58 = vadd.f32 0.5, %v1101_v50  ;;  %v1080_v62 = vpop.f32.mrf.mxu2  ;;  %v1093_v2 = vpop.f32.mrf.mxu3 }
 0x40d   : > { %v1762_v7 = vpop.eup %1761 }
 0x40e   : > { %v1108_v18 = vmul.f32 %v1102_v58, %v2462_v28  ;;  %v1109_v19 = vmul.f32 %v1762_v7, %v1098_v54 }
 0x40f   : > { %v1764_v20 = vpop.eup %1763 }
 0x410   : > { %v1110_v26 = vadd.f32 %v1109_v19, %v1108_v18  ;;  %v1106_v30 = vmul.f32 0.5, %v1764_v20 }
 0x412   : > { %1765 = vtanh.f32 %v1110_v26  ;;  %v1107_v31 = vadd.f32 0.5, %v1106_v30 }
 0x418   : > { %v1766_v27 = vpop.eup %1765 }
 0x419   : > { %v1112_v39 = vmul.f32 %v1766_v27, %v1107_v31 }
 0x41b   : > { %v1113_v41 = vpack.c.bf16 %v1112_v39, %v1112_v39 }
 0x41d   : > { %1122 = vmatmul.bf16.vlgmr.msrb.gmra.mxu0 %v1113_v41  ;;  %1135 = vmatmul.bf16.vlgmr.msrb.gmra.mxu1 %v1113_v41 }
 0x41e   : > { %1148 = vmatmul.bf16.vlgmr.msrb.gmra.mxu2 %v1113_v41  ;;  %1161 = vmatmul.bf16.vlgmr.msrb.gmra.mxu3 %v1113_v41 }
 0x49a   : > { %v1123_v8 = vpop.f32.mrf.mxu0  ;;  %v1136_v44 = vpop.f32.mrf.mxu1 }
 0x49b   : > { %v1124_v9 = vadd.f32 %v1123_v8, %v2578_v6  ;;  %v1137_v61 = vadd.f32 %v1136_v44, %v2579_v10 }
 0x49d   : > { %v1166_v60 = vmul.f32 0.5, %v1124_v9  ;;  %v1170_v22 = vmul.f32 0.5, %v1137_v61 }
 0x49f   : > { %1767 = vtanh.f32 %v1166_v60 }
 0x4a0   : > { %1769 = vtanh.f32 %v1170_v22 }
 0x4a1   : > { %v1149_v4 = vpop.f32.mrf.mxu2  ;;  %v1162_v51 = vpop.f32.mrf.mxu3 }
 0x4a2   : > { %v1150_v14 = vadd.f32 %v1149_v4, %v2580_v59  ;;  %v1163_v3 = vadd.f32 %v1162_v51, %v2581_v21  ;;  %v1125_v40 = vpop.f32.mrf.mxu0  ;;  %v1138_v15 = vpop.f32.mrf.mxu1 }
 0x4a4   : > { %1771 = vtanh.f32 %v1150_v14  ;;  %v1175_v46 = vmul.f32 0.5, %v1163_v3 }
 0x4a5   : > { %v1768_v32 = vpop.eup %1767 }
 0x4a6   : > { %v1770_v43 = vpop.eup %1769  ;;  %v1168_v55 = vmul.f32 0.5, %v1768_v32  ;;  %1773 = vtanh.f32 %v1175_v46 }
 0x4a7   : > { %v1172_v33 = vmul.f32 0.5, %v1770_v43 }
 0x4a8   : > { %v1169_v28 = vadd.f32 0.5, %v1168_v55 }
 0x4a9   : > { %v1173_v45 = vadd.f32 0.5, %v1172_v33  ;;  %v1151_v56 = vpop.f32.mrf.mxu2  ;;  %v1164_v35 = vpop.f32.mrf.mxu3 }
 0x4aa   : > { %v1772_v47 = vpop.eup %1771 }
 0x4ab   : > { %v1179_v52 = vmul.f32 %v1173_v45, %v1110_v26  ;;  %v1180_v53 = vmul.f32 %v1772_v47, %v1169_v28 }
 0x4ac   : > { %v1774_v57 = vpop.eup %1773 }
 0x4ad   : > { %v1181_v63 = vadd.f32 %v1180_v53, %v1179_v52  ;;  %v1177_v0 = vmul.f32 0.5, %v1774_v57 }
 0x4af   : > { %1775 = vtanh.f32 %v1181_v63  ;;  %v1178_v1 = vadd.f32 0.5, %v1177_v0 }
 0x4b5   : > { %v1776_v5 = vpop.eup %1775 }
 0x4b6   : > { %v1183_v11 = vmul.f32 %v1776_v5, %v1178_v1 }
 0x4b8   : > { %v1184_v12 = vpack.c.bf16 %v1183_v11, %v1183_v11 }
 0x4ba   : > { %1193 = vmatmul.bf16.vlgmr.msra.gmra.mxu0 %v1184_v12  ;;  %1206 = vmatmul.bf16.vlgmr.msra.gmra.mxu1 %v1184_v12 }
 0x4bb   : > { %1219 = vmatmul.bf16.vlgmr.msra.gmra.mxu2 %v1184_v12  ;;  %1232 = vmatmul.bf16.vlgmr.msra.gmra.mxu3 %v1184_v12 }
 0x537   : > { %v1194_v13 = vpop.f32.mrf.mxu0  ;;  %v1207_v17 = vpop.f32.mrf.mxu1 }
 0x538   : > { %v1195_v23 = vadd.f32 %v1194_v13, %v2288_v34  ;;  %v1208_v24 = vadd.f32 %v1207_v17, %v2290_v16 }
 0x53a   : > { %v1237_v25 = vmul.f32 0.5, %v1195_v23  ;;  %v1241_v29 = vmul.f32 0.5, %v1208_v24 }
 0x53c   : > { %1777 = vtanh.f32 %v1237_v25 }
 0x53d   : > { %1779 = vtanh.f32 %v1241_v29 }
 0x53e   : > { %v1220_v36 = vpop.f32.mrf.mxu2  ;;  %v1233_v37 = vpop.f32.mrf.mxu3 }
 0x53f   : > { %v1221_v42 = vadd.f32 %v1220_v36, %v2582_v38  ;;  %v1234_v49 = vadd.f32 %v1233_v37, %v2583_v48  ;;  %v1196_v50 = vpop.f32.mrf.mxu0  ;;  %v1209_v54 = vpop.f32.mrf.mxu1 }
 0x541   : > { %1781 = vtanh.f32 %v1221_v42  ;;  %v1246_v58 = vmul.f32 0.5, %v1234_v49 }
 0x542   : > { %v1778_v62 = vpop.eup %1777 }
 0x543   : > { %v1780_v2 = vpop.eup %1779  ;;  %v1239_v34 = vmul.f32 0.5, %v1778_v62  ;;  %1783 = vtanh.f32 %v1246_v58 }
 0x544   : > { %v1243_v16 = vmul.f32 0.5, %v1780_v2 }
 0x545   : > { %v1240_v7 = vadd.f32 0.5, %v1239_v34 }
 0x546   : > { %v1244_v18 = vadd.f32 0.5, %v1243_v16  ;;  %v1222_v19 = vpop.f32.mrf.mxu2  ;;  %v1235_v20 = vpop.f32.mrf.mxu3 }
 0x547   : > { %v1782_v26 = vpop.eup %1781 }
 0x548   : > { %v1250_v30 = vmul.f32 %v1244_v18, %v1181_v63  ;;  %v1251_v31 = vmul.f32 %v1782_v26, %v1240_v7 }
 0x549   : > { %v1784_v27 = vpop.eup %1783 }
 0x54a   : > { %v1252_v39 = vadd.f32 %v1251_v31, %v1250_v30  ;;  %v1248_v41 = vmul.f32 0.5, %v1784_v27 }
 0x54c   : > { %1785 = vtanh.f32 %v1252_v39  ;;  %v1249_v8 = vadd.f32 0.5, %v1248_v41 }
 0x552   : > { %v1786_v44 = vpop.eup %1785 }
 0x553   : > { %v1254_v6 = vmul.f32 %v1786_v44, %v1249_v8 }
 0x555   : > { %1255 = vst [vmem:[%s225_s9] sm:$0xff] %v1254_v6 }
 0x556   : > { %1874 = shalt.err (!%p1871_p8)
}
 0x557   : > { %1652 = dma.vmem_to_hbm [thread:$0]  (%p1987_p5), %s1270_s10, 128, %s1272_s11, %s1257_s12  }
 0x558 PF: > { %p1669_p9 = scmp.ge.s32.totalorder %s1917_s18, 2  ;;  %s1283_s28 = sand.u32 1, %s1905_s15  }
 0x559   : > { %s1284_s29 = scalar_lea.sflag [#allocation4], %s1283_s28 }
 0x55a   : > { %p1662_p10 = pnand %p1669_p9, %p1991_p6 }
 0x55c   : > { %p1663_p11 = pneg %p1662_p10 }
 0x55e   : > { %1900 = dma.done.wait (%p1663_p11), %s1284_s29, 128  }
 0x55f   : > { %1902 = vsyncadd (%p1663_p11), %s1284_s29, 4294967168  ;;  %p16_p12 = scmp.ge.s32.totalorder %s1974_s21, 4   ;;  %s2584_s15 = smov %s1909_s16 }
 0x560   : > { %s2585_s16 = smov %s1913_s17  ;;  %s2586_s17 = smov %s1985_s24 }
 0x561   : > { %s2587_s18 = smov %s1974_s21  ;;  %18 = sbr.rel (!%p16_p12) target bundleno = 5 (0x5), region = 80 }
 0x566   :  { %1290 = vsyncpa [#allocation3], 1 }
 0x567   :  { %1292 = vsyncpa [#allocation3 + $0x1], 1 }
 0x568   :  { %1293 = vsyncpa [#allocation6], 1 }
 0x569   :  { %1294 = vsyncpa [#allocation4], 1 }
 0x56a   :  { %1296 = vsyncpa [#allocation4 + $0x1], 1 }

</bundles_post_ra>
